<compile_context>
chip_gen: v7x
topology: tpu7x:2x2x1
jax: 0.10.0
libtpu: 0.0.40
codegen_flags: <defaults>
</compile_context>

<pallas_src>
import functools

import numpy as np
import jax
import jax.numpy as jnp
from jax.experimental import pallas as pl
from jax.experimental.pallas import tpu as pltpu

WIN = 11
SIGMA = 1.5
PAD = WIN // 2
C1 = 0.01 ** 2
C2 = 0.03 ** 2

# Deterministic Gaussian window (same formula as pytorch_ssim.gaussian).
_g = np.exp(-((np.arange(WIN) - WIN // 2) ** 2) / (2.0 * SIGMA ** 2))
_g = (_g / _g.sum()).astype(np.float32)


def _gauss_toeplitz(n: int) -> np.ndarray:
    """(n, n) banded Toeplitz matrix implementing the 1-D Gaussian blur with
    SAME zero padding (symmetric, usable on either side of a matmul)."""
    idx = np.arange(n)
    d = idx[:, None] - idx[None, :]
    t = np.zeros((n, n), np.float32)
    inside = np.abs(d) <= PAD
    t[inside] = _g[(d + PAD)[inside]]
    return t


def _ssim_kernel(x_ref, y_ref, gh_ref, gw_ref, o_ref, *, H, W, G, BC, need_mask):
    x = x_ref[0]          # (H_pad, GW_pad) f32, G images packed on lanes
    y = y_ref[0]
    gh = gh_ref[...]      # (H_pad, H_pad)   vertical blur (zero-pad SAME)
    gw = gw_ref[...]      # (GW_pad, GW_pad) horizontal blur, block-diag kron(I_G, T_W)

    def blur(m):
        v = jnp.dot(gh, m, precision=jax.lax.Precision.HIGHEST,
                    preferred_element_type=jnp.float32)
        return jnp.dot(v, gw, precision=jax.lax.Precision.HIGHEST,
                       preferred_element_type=jnp.float32)

    mu1 = blur(x)
    mu2 = blur(y)
    e_xx = blur(x * x)
    e_yy = blur(y * y)
    e_xy = blur(x * y)

    mu1_sq = mu1 * mu1
    mu2_sq = mu2 * mu2
    mu1_mu2 = mu1 * mu2
    sigma1_sq = e_xx - mu1_sq
    sigma2_sq = e_yy - mu2_sq
    sigma12 = e_xy - mu1_mu2

    # Exact division kept on purpose (approx reciprocal can miss 1e-4 in
    # low-variance regions where the denominator ~ C1*C2).
    ssim_map = ((2.0 * mu1_mu2 + C1) * (2.0 * sigma12 + C2)) / (
        (mu1_sq + mu2_sq + C1) * (sigma1_sq + sigma2_sq + C2))

    if need_mask:
        # Mask out lane padding / padded images in the last group with plain
        # compares (no integer divide).  Statically skipped when unpadded.
        i = pl.program_id(0)
        n_valid = jnp.minimum(G, BC - i * G)
        col = jax.lax.broadcasted_iota(jnp.int32, ssim_map.shape, 1)
        ok = col < n_valid * W
        if ssim_map.shape[0] != H:
            row = jax.lax.broadcasted_iota(jnp.int32, ssim_map.shape, 0)
            ok = ok & (row < H)
        ssim_map = jnp.where(ok, ssim_map, 0.0)

    # Lane-dense (8,128) output tile; wrapper reads [:, 0, 0].
    o_ref[...] = jnp.full((1, 8, 128), jnp.sum(ssim_map), dtype=jnp.float32)


def l_ssim_loss(R_low, high):
    """loss = 1 - SSIM(R_low, high).mean()   (scalar, float32)."""
    B, C, H, W = R_low.shape
    BC = B * C
    x = R_low.reshape(BC, H, W).astype(jnp.float32)
    y = high.reshape(BC, H, W).astype(jnp.float32)

    # Pack G images side-by-side on the lane axis.  Target ~512 lanes (v5e
    # per-step amortization) but cap so num_groups >= 2: the "parallel" grid
    # axis then has work for both v7x TensorCores.
    G = max(1, min(BC, 512 // max(W, 1), -(-BC // 2)))
    num_groups = -(-BC // G)
    BC_pad = num_groups * G
    if BC_pad != BC:
        pad = ((0, BC_pad - BC), (0, 0), (0, 0))
        x = jnp.pad(x, pad)
        y = jnp.pad(y, pad)

    GW = G * W
    # TODO(synk): move this relayout in-kernel (pltpu.einshape on a (1,G,H,W)
    # block, XLU is idle) to avoid an extra HBM read+write of both inputs
    # when G > 1; it is a no-op when G == 1.
    x = x.reshape(num_groups, G, H, W).transpose(0, 2, 1, 3).reshape(num_groups, H, GW)
    y = y.reshape(num_groups, G, H, W).transpose(0, 2, 1, 3).reshape(num_groups, H, GW)

    # Align the per-step slab to (8, 128) tiles (zero padding, masked below).
    H_pad = -(-H // 8) * 8
    GW_pad = -(-GW // 128) * 128
    if (H_pad, GW_pad) != (H, GW):
        pad = ((0, 0), (0, H_pad - H), (0, GW_pad - GW))
        x = jnp.pad(x, pad)
        y = jnp.pad(y, pad)

    # Banded Gaussian Toeplitz matrices (SAME zero padding baked in):
    #   vertical:   T_H              (H_pad, H_pad)
    #   horizontal: kron(I_G, T_W)   (GW_pad, GW_pad), zero in the lane padding
    gh = jnp.asarray(_gauss_toeplitz(H_pad))
    gw_np = np.zeros((GW_pad, GW_pad), np.float32)
    gw_np[:GW, :GW] = np.kron(np.eye(G, dtype=np.float32), _gauss_toeplitz(W))
    gw = jnp.asarray(gw_np)

    need_mask = (BC_pad != BC) or (H_pad != H) or (GW_pad != GW)
    kernel = functools.partial(_ssim_kernel, H=H, W=W, G=G, BC=BC,
                               need_mask=need_mask)

    # TODO(synk): for images where the f32 (H_pad, GW_pad) slab approaches the
    # VMEM budget (v7x: 64 MiB physical / 32 MiB default scoped) tile H with a
    # 5-row halo and set CompilerParams(vmem_limit_bytes=...); not needed at
    # these sizes.
    partials = pl.pallas_call(
        kernel,
        out_shape=jax.ShapeDtypeStruct((num_groups, 8, 128), jnp.float32),
        grid_spec=pltpu.PrefetchScalarGridSpec(
            num_scalar_prefetch=0,
            grid=(num_groups,),
            in_specs=[
                pl.BlockSpec((1, H_pad, GW_pad), lambda i: (i, 0, 0)),
                pl.BlockSpec((1, H_pad, GW_pad), lambda i: (i, 0, 0)),
                # Constant blocks (index_map (0,0) every step).  After the
                # kron(I5,.) removal they are tiny (H^2 + GW^2 floats).
                # TODO(synk): single-buffer them (pipeline_mode=pl.Buffered(1))
                # once validated across generations to reclaim the duplicate.
                pl.BlockSpec((H_pad, H_pad), lambda i: (0, 0)),
                pl.BlockSpec((GW_pad, GW_pad), lambda i: (0, 0)),
            ],
            out_specs=pl.BlockSpec((1, 8, 128), lambda i: (i, 0, 0)),
        ),
        compiler_params=pltpu.CompilerParams(
            dimension_semantics=("parallel",)),   # groups are fully independent
    )(x, y, gh, gw)

    total = jnp.float32(BC * H * W)
    return jnp.float32(1.0) - jnp.sum(partials[:, 0, 0]) / total


def _l_ssim_ref(R_low, high):
    """Pure-JAX reference (depthwise 2-D conv), for correctness checking."""
    B, C, H, W = R_low.shape
    w2d = jnp.asarray(np.outer(_g, _g), jnp.float32)
    win = jnp.broadcast_to(w2d[None, None], (C, 1, WIN, WIN))

    def conv(img):
        return jax.lax.conv_general_dilated(
            img, win, window_strides=(1, 1),
            padding=[(PAD, PAD), (PAD, PAD)],
            feature_group_count=C,
            dimension_numbers=("NCHW", "OIHW", "NCHW"),
            precision=jax.lax.Precision.HIGHEST)

    x = R_low.astype(jnp.float32)
    y = high.astype(jnp.float32)
    mu1, mu2 = conv(x), conv(y)
    mu1_sq, mu2_sq, mu1_mu2 = mu1 * mu1, mu2 * mu2, mu1 * mu2
    s1 = conv(x * x) - mu1_sq
    s2 = conv(y * y) - mu2_sq
    s12 = conv(x * y) - mu1_mu2
    ssim_map = ((2 * mu1_mu2 + C1) * (2 * s12 + C2)) / (
        (mu1_sq + mu2_sq + C1) * (s1 + s2 + C2))
    return 1.0 - ssim_map.mean()


if __name__ == "__main__":
    key = jax.random.PRNGKey(0)
    k1, k2 = jax.random.split(key)
    B, C, H, W = 2, 4, 16, 16
    R_low = jax.random.uniform(k1, (B, C, H, W), dtype=jnp.float32)
    high = jax.random.uniform(k2, (B, C, H, W), dtype=jnp.float32)

    loss = jax.block_until_ready(jax.jit(l_ssim_loss)(R_low, high))
    ref = jax.block_until_ready(_l_ssim_ref(R_low, high))

    np.testing.assert_allclose(np.array(loss), np.array(ref), rtol=1e-4, atol=1e-4)
    print("KERNEL_OK")
</pallas_src>

<mosaic_0001>
module attributes {stable_mosaic.version = 11 : i64} {
  func.func @_ssim_kernel(%arg0: i32, %arg1: memref<1x16x128xf32, #tpu.memory_space<vmem>>, %arg2: memref<1x16x128xf32, #tpu.memory_space<vmem>>, %arg3: memref<16x16xf32, #tpu.memory_space<vmem>>, %arg4: memref<128x128xf32, #tpu.memory_space<vmem>>, %arg5: memref<1x8x128xf32, #tpu.memory_space<vmem>>) attributes {dimension_semantics = [#tpu.dimension_semantics<parallel>], iteration_bounds = array<i64: 2>, scalar_prefetch = 0 : i64, scratch_operands = 0 : i64, tpu.core_type = #tpu.core_type<tc>, window_params = [{transform_indices = @transform_0, window_bounds = array<i64: 1, 16, 128>}, {transform_indices = @transform_1, window_bounds = array<i64: 1, 16, 128>}, {pipeline_mode = #tpu.pipeline_mode<synchronous>, transform_indices = @transform_2, window_bounds = array<i64: 16, 16>}, {pipeline_mode = #tpu.pipeline_mode<synchronous>, transform_indices = @transform_3, window_bounds = array<i64: 128, 128>}, {transform_indices = @transform_4, window_bounds = array<i64: 1, 8, 128>}]} {
    %c0 = arith.constant 0 : index
    %c0_0 = arith.constant 0 : index
    %c0_1 = arith.constant 0 : index
    %0 = vector.load %arg1[%c0, %c0_0, %c0_1] : memref<1x16x128xf32, #tpu.memory_space<vmem>>, vector<1x16x128xf32>
    %1 = vector.shape_cast %0 : vector<1x16x128xf32> to vector<16x128xf32>
    %c0_2 = arith.constant 0 : index
    %c0_3 = arith.constant 0 : index
    %c0_4 = arith.constant 0 : index
    %2 = vector.load %arg2[%c0_2, %c0_3, %c0_4] : memref<1x16x128xf32, #tpu.memory_space<vmem>>, vector<1x16x128xf32>
    %3 = vector.shape_cast %2 : vector<1x16x128xf32> to vector<16x128xf32>
    %c0_5 = arith.constant 0 : index
    %c0_6 = arith.constant 0 : index
    %4 = vector.load %arg3[%c0_5, %c0_6] : memref<16x16xf32, #tpu.memory_space<vmem>>, vector<16x16xf32>
    %c0_7 = arith.constant 0 : index
    %c0_8 = arith.constant 0 : index
    %5 = vector.load %arg4[%c0_7, %c0_8] : memref<128x128xf32, #tpu.memory_space<vmem>>, vector<128x128xf32>
    %cst = arith.constant dense<0.000000e+00> : vector<16x128xf32>
    %6 = tpu.matmul %4, %1, %cst {dimension_numbers = #tpu.dot_dimension_numbers<[1], [0], [0], [1], [0, 0, 1, 1], [], []>, precision = #tpu.contract_precision<fp32>} : vector<16x16xf32>, vector<16x128xf32>, vector<16x128xf32> -> vector<16x128xf32>
    %cst_9 = arith.constant dense<0.000000e+00> : vector<16x128xf32>
    %7 = tpu.matmul %6, %5, %cst_9 {dimension_numbers = #tpu.dot_dimension_numbers<[1], [0], [0], [1], [0, 0, 1, 1], [], []>, precision = #tpu.contract_precision<fp32>} : vector<16x128xf32>, vector<128x128xf32>, vector<16x128xf32> -> vector<16x128xf32>
    %cst_10 = arith.constant dense<0.000000e+00> : vector<16x128xf32>
    %8 = tpu.matmul %4, %3, %cst_10 {dimension_numbers = #tpu.dot_dimension_numbers<[1], [0], [0], [1], [0, 0, 1, 1], [], []>, precision = #tpu.contract_precision<fp32>} : vector<16x16xf32>, vector<16x128xf32>, vector<16x128xf32> -> vector<16x128xf32>
    %cst_11 = arith.constant dense<0.000000e+00> : vector<16x128xf32>
    %9 = tpu.matmul %8, %5, %cst_11 {dimension_numbers = #tpu.dot_dimension_numbers<[1], [0], [0], [1], [0, 0, 1, 1], [], []>, precision = #tpu.contract_precision<fp32>} : vector<16x128xf32>, vector<128x128xf32>, vector<16x128xf32> -> vector<16x128xf32>
    %10 = arith.mulf %1, %1 : vector<16x128xf32>
    %cst_12 = arith.constant dense<0.000000e+00> : vector<16x128xf32>
    %11 = tpu.matmul %4, %10, %cst_12 {dimension_numbers = #tpu.dot_dimension_numbers<[1], [0], [0], [1], [0, 0, 1, 1], [], []>, precision = #tpu.contract_precision<fp32>} : vector<16x16xf32>, vector<16x128xf32>, vector<16x128xf32> -> vector<16x128xf32>
    %cst_13 = arith.constant dense<0.000000e+00> : vector<16x128xf32>
    %12 = tpu.matmul %11, %5, %cst_13 {dimension_numbers = #tpu.dot_dimension_numbers<[1], [0], [0], [1], [0, 0, 1, 1], [], []>, precision = #tpu.contract_precision<fp32>} : vector<16x128xf32>, vector<128x128xf32>, vector<16x128xf32> -> vector<16x128xf32>
    %13 = arith.mulf %3, %3 : vector<16x128xf32>
    %cst_14 = arith.constant dense<0.000000e+00> : vector<16x128xf32>
    %14 = tpu.matmul %4, %13, %cst_14 {dimension_numbers = #tpu.dot_dimension_numbers<[1], [0], [0], [1], [0, 0, 1, 1], [], []>, precision = #tpu.contract_precision<fp32>} : vector<16x16xf32>, vector<16x128xf32>, vector<16x128xf32> -> vector<16x128xf32>
    %cst_15 = arith.constant dense<0.000000e+00> : vector<16x128xf32>
    %15 = tpu.matmul %14, %5, %cst_15 {dimension_numbers = #tpu.dot_dimension_numbers<[1], [0], [0], [1], [0, 0, 1, 1], [], []>, precision = #tpu.contract_precision<fp32>} : vector<16x128xf32>, vector<128x128xf32>, vector<16x128xf32> -> vector<16x128xf32>
    %16 = arith.mulf %1, %3 : vector<16x128xf32>
    %cst_16 = arith.constant dense<0.000000e+00> : vector<16x128xf32>
    %17 = tpu.matmul %4, %16, %cst_16 {dimension_numbers = #tpu.dot_dimension_numbers<[1], [0], [0], [1], [0, 0, 1, 1], [], []>, precision = #tpu.contract_precision<fp32>} : vector<16x16xf32>, vector<16x128xf32>, vector<16x128xf32> -> vector<16x128xf32>
    %cst_17 = arith.constant dense<0.000000e+00> : vector<16x128xf32>
    %18 = tpu.matmul %17, %5, %cst_17 {dimension_numbers = #tpu.dot_dimension_numbers<[1], [0], [0], [1], [0, 0, 1, 1], [], []>, precision = #tpu.contract_precision<fp32>} : vector<16x128xf32>, vector<128x128xf32>, vector<16x128xf32> -> vector<16x128xf32>
    %19 = arith.mulf %7, %7 : vector<16x128xf32>
    %20 = arith.mulf %9, %9 : vector<16x128xf32>
    %21 = arith.mulf %7, %9 : vector<16x128xf32>
    %22 = arith.subf %12, %19 : vector<16x128xf32>
    %23 = arith.subf %15, %20 : vector<16x128xf32>
    %24 = arith.subf %18, %21 : vector<16x128xf32>
    %cst_18 = arith.constant 2.000000e+00 : f32
    %25 = vector.broadcast %cst_18 : f32 to vector<16x128xf32>
    %26 = arith.mulf %25, %21 : vector<16x128xf32>
    %cst_19 = arith.constant 9.99999974E-5 : f32
    %27 = vector.broadcast %cst_19 : f32 to vector<16x128xf32>
    %28 = arith.addf %26, %27 : vector<16x128xf32>
    %cst_20 = arith.constant 2.000000e+00 : f32
    %29 = vector.broadcast %cst_20 : f32 to vector<16x128xf32>
    %30 = arith.mulf %29, %24 : vector<16x128xf32>
    %cst_21 = arith.constant 8.99999984E-4 : f32
    %31 = vector.broadcast %cst_21 : f32 to vector<16x128xf32>
    %32 = arith.addf %30, %31 : vector<16x128xf32>
    %33 = arith.mulf %28, %32 : vector<16x128xf32>
    %34 = arith.addf %19, %20 : vector<16x128xf32>
    %cst_22 = arith.constant 9.99999974E-5 : f32
    %35 = vector.broadcast %cst_22 : f32 to vector<16x128xf32>
    %36 = arith.addf %34, %35 : vector<16x128xf32>
    %37 = arith.addf %22, %23 : vector<16x128xf32>
    %cst_23 = arith.constant 8.99999984E-4 : f32
    %38 = vector.broadcast %cst_23 : f32 to vector<16x128xf32>
    %39 = arith.addf %37, %38 : vector<16x128xf32>
    %40 = arith.mulf %36, %39 : vector<16x128xf32>
    %41 = arith.divf %33, %40 : vector<16x128xf32>
    %c4_i32 = arith.constant 4 : i32
    %42 = arith.muli %arg0, %c4_i32 : i32
    %c8_i32 = arith.constant 8 : i32
    %43 = arith.subi %c8_i32, %42 : i32
    %c4_i32_24 = arith.constant 4 : i32
    %44 = arith.minsi %c4_i32_24, %43 : i32
    %45 = tpu.iota {dimensions = array<i32: 1>} : vector<16x128xi32>
    %c16_i32 = arith.constant 16 : i32
    %46 = arith.muli %44, %c16_i32 : i32
    %47 = vector.broadcast %46 : i32 to vector<16x128xi32>
    %48 = arith.cmpi slt, %45, %47 : vector<16x128xi32>
    %cst_25 = arith.constant 0.000000e+00 : f32
    %49 = vector.broadcast %cst_25 : f32 to vector<16x128xf32>
    %50 = arith.select %48, %41, %49 : vector<16x128xi1>, vector<16x128xf32>
    %51 = vector.shape_cast %50 : vector<16x128xf32> to vector<1x16x128xf32>
    %cst_26 = arith.constant dense<0.000000e+00> : vector<1xf32>
    %52 = vector.multi_reduction <add>, %51, %cst_26 [1, 2] : vector<1x16x128xf32> to vector<1xf32>
    %53 = vector.shape_cast %52 : vector<1xf32> to vector<1x1x1xf32>
    %54 = vector.extract %53[0, 0, 0] : f32 from vector<1x1x1xf32>
    %55 = vector.broadcast %54 : f32 to vector<1x8x128xf32>
    %c0_27 = arith.constant 0 : index
    %c0_28 = arith.constant 0 : index
    %c0_29 = arith.constant 0 : index
    %56 = vector.load %arg5[%c0_27, %c0_28, %c0_29] : memref<1x8x128xf32, #tpu.memory_space<vmem>>, vector<1x8x128xf32>
    tpu.vector_store %arg5[%c0_27, %c0_28, %c0_29], %55 {strides = array<i32>} : memref<1x8x128xf32, #tpu.memory_space<vmem>>, vector<1x8x128xf32>,
    return
  }
  func.func @transform_0(%arg0: i32) -> (i32, i32, i32) {
    %c0_i32 = arith.constant 0 : i32
    %c0_i32_0 = arith.constant 0 : i32
    %c0_i32_1 = arith.constant 0 : i32
    return %arg0, %c0_i32, %c0_i32_0 : i32, i32, i32
  }
  func.func @transform_1(%arg0: i32) -> (i32, i32, i32) {
    %c0_i32 = arith.constant 0 : i32
    %c0_i32_0 = arith.constant 0 : i32
    %c0_i32_1 = arith.constant 0 : i32
    return %arg0, %c0_i32, %c0_i32_0 : i32, i32, i32
  }
  func.func @transform_2(%arg0: i32) -> (i32, i32) {
    %c0_i32 = arith.constant 0 : i32
    %c0_i32_0 = arith.constant 0 : i32
    %c0_i32_1 = arith.constant 0 : i32
    return %c0_i32, %c0_i32_0 : i32, i32
  }
  func.func @transform_3(%arg0: i32) -> (i32, i32) {
    %c0_i32 = arith.constant 0 : i32
    %c0_i32_0 = arith.constant 0 : i32
    %c0_i32_1 = arith.constant 0 : i32
    return %c0_i32, %c0_i32_0 : i32, i32
  }
  func.func @transform_4(%arg0: i32) -> (i32, i32, i32) {
    %c0_i32 = arith.constant 0 : i32
    %c0_i32_0 = arith.constant 0 : i32
    %c0_i32_1 = arith.constant 0 : i32
    return %arg0, %c0_i32, %c0_i32_0 : i32, i32, i32
  }
}

</mosaic_0001>

<bundles_post_ra>
// kernel: l_ssim_loss.1
= control target key start
LH: loop header
LB: loop body
LE: loop exit
PB: predicated region body
PF: predicated region fallthrough
CT: control target
= control target key end

     0   :  { %s9470_s15 = smov 0   ;;  %s10577_s0 = inlined_call_operand.vmem [shape: f32[2,16,128], index: 0, kind: input, shape index: {}]   ;;  %s10578_s1 = inlined_call_operand.vmem [shape: f32[2,16,128], index: 1, kind: input, shape index: {}]   ;;  %s10579_s2 = inlined_call_operand.vmem [shape: f32[16,16], index: 2, kind: input, shape index: {}]   ;;  %s10580_s3 = inlined_call_operand.vmem [shape: f32[128,128], index: 3, kind: input, shape index: {}]   ;;  %s10581_s4 = inlined_call_operand.vmem [shape: f32[2,8,128], index: 4, kind: output, shape index: {}]  }
   0x1 LB: > { %s9476_s16 = sadd.s32 4294967295, %s9443_s15   ;;  %p6309_p0 = scmp.ge.s32.totalorder %s9443_s15, 1  ;;  %s9443_s15 = sphi %s9470_s15, %s14_s15  }
   0x2   : > { %p172_p1 = scmp.lt.s32.totalorder %s9443_s15, 3 }
   0x4   : > { %p173_p2 = pnand %p6309_p0, %p172_p1 }
   0x6   : > { %176 = sbr.rel (%p173_p2) target bundleno = 1633 (0x661), region = 36 }
   0xd   : > { %p202_p3 = scmp.lt.s32.totalorder %s9476_s16, 1  ;;  %v220_v0 = vld [vmem:[%s10579_s2] sm:$0xff]  ;;  %vm238_vm0 = vcmask 130048   ;;  %v221_v1 = vld [vmem:[%s10579_s2 + $0x8] sm:$0xff]  ;;  %v9559_v35 = vld [vmem:[%s10580_s3 + $0x10] sm:$0xff] }
   0xe   : > { %v240_v2 = vsel %vm238_vm0, %v220_v0, 0  ;;  %v243_v3 = vsel %vm238_vm0, %v221_v1, 0  ;;  %v9539_v28 = vld [vmem:[%s10580_s3] sm:$0xff]  ;;  %v9544_v29 = vld [vmem:[%s10580_s3 + $0x8] sm:$0xff]  ;;  %v9564_v36 = vld [vmem:[%s10580_s3 + $0x18] sm:$0xff]  ;;  %v754_v37 = vand.u32 4294901760, %v9559_v35 }
   0xf   : > { %s9488_s21 = scalar_select %p202_p3, %s9476_s16, 1  ;;  %v9490_v4 = vand.u32 4294901760, %v240_v2  ;;  %v9492_v5 = vand.u32 4294901760, %v243_v3  ;;  %v748_v32 = vand.u32 4294901760, %v9539_v28  ;;  %v751_v33 = vand.u32 4294901760, %v9544_v29  ;;  %v9577_v39 = vld [vmem:[%s10580_s3 + $0x20] sm:$0xff] }
  0x10   : > { %v757_v38 = vand.u32 4294901760, %v9564_v36  ;;  %v9582_v40 = vld [vmem:[%s10580_s3 + $0x28] sm:$0xff]  ;;  %v760_v42 = vand.u32 4294901760, %v9577_v39  ;;  %v9595_v44 = vld [vmem:[%s10580_s3 + $0x30] sm:$0xff]  ;;  %v9600_v45 = vld [vmem:[%s10580_s3 + $0x38] sm:$0xff] }
  0x11   : > { %s6319_s22 = sshll.u32 %s9488_s21, 4  ;;  %v9496_v6 = vsub.f32 %v240_v2, %v9490_v4  ;;  %v9499_v7 = vsub.f32 %v243_v3, %v9492_v5  ;;  %v9554_v34 = vpack.c.bf16 %v751_v33, %v748_v32  ;;  %v763_v43 = vand.u32 4294901760, %v9582_v40  ;;  %v9619_v49 = vld [vmem:[%s10580_s3 + $0x40] sm:$0xff]  ;;  %v9624_v50 = vld [vmem:[%s10580_s3 + $0x48] sm:$0xff]  ;;  %v9641_v54 = vld [vmem:[%s10580_s3 + $0x50] sm:$0xff]  ;;  %s6314_s14 = sshll.u32 %s9488_s21, 3 }
  0x12   : > { %s9506_s25 = scalar_lea.vmem %s10577_s0, %s6319_s22  ;;  %v9588_v41 = vpack.c.bf16 %v757_v38, %v754_v37  ;;  %v766_v47 = vand.u32 4294901760, %v9595_v44  ;;  %v769_v48 = vand.u32 4294901760, %v9600_v45  ;;  %v772_v52 = vand.u32 4294901760, %v9619_v49  ;;  %v9646_v55 = vld [vmem:[%s10580_s3 + $0x58] sm:$0xff]  ;;  %v234_v60 = vld [vmem:[%s10580_s3 + $0x60] sm:$0xff]  ;;  %v235_v61 = vld [vmem:[%s10580_s3 + $0x68] sm:$0xff]  ;;  %s211_s13 = scalar_lea.vmem %s10578_s1, %s6319_s22 }
  0x13   : > { %v9509_v8 = vld [vmem:[%s9506_s25] sm:$0xff]  ;;  %v9512_v9 = vld [vmem:[%s9506_s25 + $0x8] sm:$0xff]  ;;  %v9515_v10 = vand.u32 4294901760, %v9496_v6  ;;  %v9518_v11 = vand.u32 4294901760, %v9499_v7  ;;  %v9612_v46 = vpack.c.bf16 %v763_v43, %v760_v42  ;;  %v10584_v53 = vand.u32 4294901760, %v9624_v50  ;;  %v236_v1 = vld [vmem:[%s10580_s3 + $0x70] sm:$0xff]  ;;  %s215_s19 = scalar_lea.vmem %s10581_s4, %s6314_s14 }
  0x14   : > { %v246_v12 = vand.u32 4294901760, %v9509_v8  ;;  %v249_v13 = vand.u32 4294901760, %v9512_v9  ;;  %v9634_v51 = vpack.c.bf16 %v769_v48, %v766_v47  ;;  %v10583_v57 = vand.u32 4294901760, %v9641_v54  ;;  %v237_v2 = vld [vmem:[%s10580_s3 + $0x78] sm:$0xff]  ;;  %s6315_s22 = sshll.u32 %s9476_s16, 2 }
  0x15   : > { %v315_v14 = vsub.f32 %v9496_v6, %v9515_v10  ;;  %7006 = vmatprep.mubr.f32.mxu0 %v9515_v10  ;;  %v325_v15 = vsub.f32 %v9499_v7, %v9518_v11  ;;  %v9656_v56 = vpack.c.bf16 %v10584_v53, %v772_v52  ;;  %v10582_v58 = vand.u32 4294901760, %v9646_v55 }
  0x16   : > { %v8241_v16 = vpack.c.bf16 %v249_v13, %v246_v12  ;;  %v334_v17 = vsub.f32 %v9509_v8, %v246_v12  ;;  %v341_v18 = vsub.f32 %v9512_v9, %v249_v13  ;;  %v784_v62 = vand.u32 4294901760, %v234_v60 }
  0x17   : > { %v9529_v19 = vand.u32 4294901760, %v315_v14  ;;  %v9531_v20 = vand.u32 4294901760, %v325_v15  ;;  %v9668_v59 = vpack.c.bf16 %v10582_v58, %v10583_v57  ;;  %v787_v63 = vand.u32 4294901760, %v235_v61 }
  0x18   : > { %8242 = vmatprep.subr.bf16.mxu1 %v8241_v16  ;;  %8254 = vmatprep.subr.bf16.mxu0 %v8241_v16  ;;  %v335_v21 = vand.u32 4294901760, %v334_v17  ;;  %v342_v22 = vand.u32 4294901760, %v341_v18  ;;  %v8249_v31 = vpack.c.bf16 %v341_v18, %v334_v17  ;;  %v790_v3 = vand.u32 4294901760, %v236_v1 }
  0x19   : > { %8244 = vmatpush3.bf16.msra.mxu1 %v8241_v16  ;;  %8256 = vmatpush3.bf16.msra.mxu0 %v8241_v16  ;;  %v9682_v0 = vpack.c.bf16 %v787_v63, %v784_v62  ;;  %v793_v12 = vand.u32 4294901760, %v237_v2  ;;  %v850_v14 = vsub.f32 %v9539_v28, %v748_v32  ;;  %v857_v15 = vsub.f32 %v9544_v29, %v751_v33 }
  0x1a   : > { %6985 = vmatprep.mubr.f32.mxu1 %v9529_v19  ;;  %v336_v23 = vsub.f32 %v334_v17, %v335_v21  ;;  %v343_v24 = vsub.f32 %v341_v18, %v342_v22  ;;  %v8257_v25 = vpack.c.bf16 %v342_v22, %v335_v21 }
  0x1b   : > { %v9694_v13 = vpack.c.bf16 %v793_v12, %v790_v3  ;;  %v858_v17 = vand.u32 4294901760, %v857_v15  ;;  %v955_v32 = vsub.f32 %v237_v2, %v793_v12  ;;  %v9741_v12 = vsub.f32 %v9577_v39, %v760_v42 }
  0x1c   : > { %6986 = vmatmul.mubr.f32.vlgmr.msra.gmra.mrb[0].mxu1 %v9531_v20  ;;  %7007 = vmatmul.mubr.f32.vlgmr.msra.gmra.mrb[0].mxu0 %v9518_v11  ;;  %v337_v26 = vand.u32 4294901760, %v336_v23  ;;  %v344_v27 = vand.u32 4294901760, %v343_v24 }
  0x1d   : > { %8258 = vmatprep.subr.bf16.mxu0 %v8257_v25  ;;  %6992 = vmatprep.mubr.f32.mxu1 %v9490_v4  ;;  %v859_v22 = vsub.f32 %v857_v15, %v858_v17  ;;  %v956_v57 = vand.u32 4294901760, %v955_v32  ;;  %v879_v39 = vand.u32 4294901760, %v9741_v12 }
  0x1e   : > { %v8245_v30 = vpack.c.bf16 %v344_v27, %v337_v26  ;;  %8260 = vmatpush3.bf16.msra.mxu0 %v8257_v25  ;;  %7013 = vmatprep.mubr.f32.mxu0 %v9490_v4  ;;  %v934_v26 = vsub.f32 %v234_v60, %v784_v62  ;;  %v941_v27 = vsub.f32 %v235_v61, %v787_v63 }
  0x1f   : > { %8262 = vmatprep.subr.bf16.mxu0 %v8241_v16  ;;  %v860_v24 = vand.u32 4294901760, %v859_v22  ;;  %v9720_v63 = vpack.c.bf16 %v857_v15, %v850_v14 }
  0x20   : > { %8246 = vmatprep.subr.bf16.mxu1 %v8245_v30  ;;  %v935_v28 = vand.u32 4294901760, %v934_v26  ;;  %v942_v29 = vand.u32 4294901760, %v941_v27 }
  0x21   : > { %8248 = vmatpush3.bf16.msra.mxu1 %v8245_v30 }
  0x22   : > { %8250 = vmatprep.subr.bf16.mxu1 %v8249_v31  ;;  %v936_v30 = vsub.f32 %v934_v26, %v935_v28  ;;  %v9712_v33 = vpack.c.bf16 %v942_v29, %v935_v28  ;;  %v943_v58 = vsub.f32 %v941_v27, %v942_v29 }
  0x24   : > { %6993 = vmatmul.mubr.f32.vlgmr.msra.gmra.mrb[0].mxu1 %v9492_v5  ;;  %7014 = vmatmul.mubr.f32.vlgmr.msra.gmra.mrb[0].mxu0 %v9492_v5  ;;  %10596 = vst [vmem:[#allocation2_spill] sm:$0xff] %v9712_v33  ;;  %v944_v53 = vand.u32 4294901760, %v943_v58  ;;  %v9729_v58 = vsub.f32 %v9559_v35, %v754_v37 }
  0x25   : > { %8252 = vmatpush3.bf16.msra.mxu1 %v8249_v31  ;;  %8264 = vmatpush3.bf16.msra.mxu0 %v8241_v16  ;;  %v851_v16 = vand.u32 4294901760, %v850_v14  ;;  %v948_v31 = vsub.f32 %v236_v1, %v790_v3  ;;  %v9722_v1 = vpack.c.bf16 %v941_v27, %v934_v26 }
  0x26   : > { %6999 = vmatprep.mubr.f32.mxu1 %v9496_v6  ;;  %7020 = vmatprep.mubr.f32.mxu0 %v9490_v4 }
  0x27   : > { %8362 = vmatprep.subr.bf16.mxu1 %v9554_v34  ;;  %8266 = vmatprep.subr.bf16.mxu0 %v9554_v34  ;;  %v9706_v18 = vpack.c.bf16 %v858_v17, %v851_v16  ;;  %v852_v21 = vsub.f32 %v850_v14, %v851_v16  ;;  %v937_v16 = vand.u32 4294901760, %v936_v30  ;;  %v949_v17 = vand.u32 4294901760, %v948_v31 }
  0x28   : > { %v9724_v2 = vpack.c.bf16 %v955_v32, %v948_v31  ;;  %v9746_v14 = vsub.f32 %v9582_v40, %v763_v43  ;;  %v9759_v40 = vsub.f32 %v9595_v44, %v766_v47  ;;  %v9764_v43 = vsub.f32 %v9600_v45, %v769_v48 }
  0x29   : > { %v853_v23 = vand.u32 4294901760, %v852_v21  ;;  %v9714_v21 = vpack.c.bf16 %v956_v57, %v949_v17  ;;  %v950_v22 = vsub.f32 %v948_v31, %v949_v17  ;;  %v9781_v48 = vsub.f32 %v9619_v49, %v772_v52 }
  0x2a   : > { %v886_v42 = vand.u32 4294901760, %v9746_v14  ;;  %v900_v45 = vand.u32 4294901760, %v9764_v43 }
  0x2b   : > { %v9709_v25 = vpack.c.bf16 %v860_v24, %v853_v23  ;;  %10597 = vst [vmem:[#allocation3_spill] sm:$0xff] %v9714_v21  ;;  %v957_v23 = vsub.f32 %v955_v32, %v956_v57  ;;  %v9716_v24 = vpack.c.bf16 %v944_v53, %v937_v16  ;;  %v951_v60 = vand.u32 4294901760, %v950_v22 }
  0x2c   : > { %7000 = vmatmul.mubr.f32.vlgmr.msra.gmra.mrb[0].mxu1 %v9499_v7  ;;  %7021 = vmatmul.mubr.f32.vlgmr.msra.gmra.mrb[0].mxu0 %v9492_v5  ;;  %v9734_v53 = vsub.f32 %v9564_v36, %v757_v38  ;;  %v865_v57 = vand.u32 4294901760, %v9729_v58  ;;  %v887_v44 = vsub.f32 %v9746_v14, %v886_v42 }
  0x2d   : > { %8364 = vmatpush3.bf16.msra.mxu1 %v9554_v34  ;;  %8268 = vmatpush3.bf16.msra.mxu0 %v9554_v34  ;;  %v958_v61 = vand.u32 4294901760, %v957_v23  ;;  %v880_v23 = vsub.f32 %v9741_v12, %v879_v39 }
  0x2e   : > { %8366 = vmatprep.subr.bf16.mxu1 %v9588_v41  ;;  %8270 = vmatprep.subr.bf16.mxu0 %v9588_v41  ;;  %v872_v3 = vand.u32 4294901760, %v9734_v53  ;;  %v866_v27 = vsub.f32 %v9729_v58, %v865_v57 }
  0x2f   : > { %v9718_v62 = vpack.c.bf16 %v958_v61, %v951_v60  ;;  %v893_v60 = vand.u32 4294901760, %v9759_v40 }
  0x30   : > { %v873_v29 = vsub.f32 %v9734_v53, %v872_v3  ;;  %v867_v16 = vand.u32 4294901760, %v866_v27  ;;  %v888_v27 = vand.u32 4294901760, %v887_v44  ;;  %v9811_v44 = vpack.c.bf16 %v886_v42, %v879_v39 }
  0x31   : > { %8368 = vmatpush3.bf16.msra.mxu1 %v9588_v41  ;;  %8272 = vmatpush3.bf16.msra.mxu0 %v9588_v41  ;;  %v894_v52 = vsub.f32 %v9759_v40, %v893_v60 }
  0x32   : > { %8370 = vmatprep.subr.bf16.mxu1 %v9612_v46  ;;  %8274 = vmatprep.subr.bf16.mxu0 %v9612_v46  ;;  %v874_v22 = vand.u32 4294901760, %v873_v29 }
  0x35   : > { %8372 = vmatpush3.bf16.msra.mxu1 %v9612_v46  ;;  %8276 = vmatpush3.bf16.msra.mxu0 %v9612_v46 }
  0x36   : > { %8374 = vmatprep.subr.bf16.mxu1 %v9634_v51  ;;  %8278 = vmatprep.subr.bf16.mxu0 %v9634_v51 }
  0x39   : > { %8376 = vmatpush3.bf16.msra.mxu1 %v9634_v51  ;;  %8280 = vmatpush3.bf16.msra.mxu0 %v9634_v51 }
  0x3a   : > { %8378 = vmatprep.subr.bf16.mxu1 %v9656_v56  ;;  %8282 = vmatprep.subr.bf16.mxu0 %v9656_v56 }
  0x3d   : > { %8380 = vmatpush3.bf16.msra.mxu1 %v9656_v56  ;;  %8284 = vmatpush3.bf16.msra.mxu0 %v9656_v56 }
  0x3e   : > { %8382 = vmatprep.subr.bf16.mxu1 %v9668_v59  ;;  %8286 = vmatprep.subr.bf16.mxu0 %v9668_v59 }
  0x41   : > { %8384 = vmatpush3.bf16.msra.mxu1 %v9668_v59  ;;  %8288 = vmatpush3.bf16.msra.mxu0 %v9668_v59 }
  0x42   : > { %8386 = vmatprep.subr.bf16.mxu1 %v9682_v0  ;;  %8290 = vmatprep.subr.bf16.mxu0 %v9682_v0 }
  0x45   : > { %8388 = vmatpush3.bf16.msra.mxu1 %v9682_v0  ;;  %8292 = vmatpush3.bf16.msra.mxu0 %v9682_v0 }
  0x46   : > { %8390 = vmatprep.subr.bf16.mxu1 %v9694_v13  ;;  %8294 = vmatprep.subr.bf16.mxu0 %v9694_v13 }
  0x49   : > { %8392 = vmatpush3.bf16.msra.mxu1 %v9694_v13  ;;  %8296 = vmatpush3.bf16.msra.mxu0 %v9694_v13 }
  0x4a   : > { %8394 = vmatprep.subr.bf16.mxu1 %v9706_v18  ;;  %8298 = vmatprep.subr.bf16.mxu0 %v9709_v25 }
  0xff   : > { %v7001_v35 = vpop.f32.mrb[0].mxu1  ;;  %v7022_v37 = vpop.f32.mrb[0].mxu0 }
 0x100   : > { %v9321_v15 = vadd.f32 %v7022_v37, %v7001_v35  ;;  %v491_v26 = vpop.f32.mrb[1].mxu1  ;;  %v737_v36 = vpop.f32.mrb[1].mxu0  ;;  %v9784_v35 = vpack.c.bf16 %v872_v3, %v865_v57  ;;  %v10598_v37 = vand.u32 4294901760, %v9624_v50  ;;  %v901_v57 = vsub.f32 %v9764_v43, %v900_v45 }
 0x101   : > { %v9322_v38 = vadd.f32 %v737_v36, %v491_v26  ;;  %v9792_v36 = vpack.c.bf16 %v874_v22, %v867_v16  ;;  %v10599_v16 = vand.u32 4294901760, %v9641_v54  ;;  %v10600_v22 = vand.u32 4294901760, %v9646_v55 }
 0x102   : > { %v9749_v28 = vand.u32 4294901760, %v9321_v15 }
 0x103   : > { %v9754_v30 = vand.u32 4294901760, %v9322_v38 }
 0x104   : > { %v9767_v31 = vsub.f32 %v9321_v15, %v9749_v28  ;;  %v9789_v15 = vsub.f32 %v9624_v50, %v10598_v37  ;;  %v907_v50 = vand.u32 4294901760, %v9781_v48  ;;  %v895_v37 = vand.u32 4294901760, %v894_v52 }
 0x105   : > { %v9770_v32 = vsub.f32 %v9322_v38, %v9754_v30  ;;  %v881_v38 = vand.u32 4294901760, %v880_v23  ;;  %v9809_v23 = vsub.f32 %v9646_v55, %v10600_v22  ;;  %v9869_v22 = vpack.c.bf16 %v9734_v53, %v9729_v58 }
 0x106   : > { %v840_v17 = vand.u32 4294901760, %v9767_v31  ;;  %v914_v29 = vand.u32 4294901760, %v9789_v15  ;;  %v908_v55 = vsub.f32 %v9781_v48, %v907_v50  ;;  %v2617_v58 = vmul.f32 %v9509_v8, %v9509_v8 }
 0x107   : > { %v830_v47 = vand.u32 4294901760, %v9770_v32  ;;  %v2618_v53 = vmul.f32 %v9512_v9, %v9512_v9  ;;  %v9899_v9 = vld [vmem:[%s211_s13] sm:$0xff] }
 0x108   : > { %v841_v61 = vsub.f32 %v9767_v31, %v840_v17  ;;  %v915_v39 = vsub.f32 %v9789_v15, %v914_v29  ;;  %v2620_v8 = vand.u32 4294901760, %v2617_v58  ;;  %10602 = vst [vmem:[#allocation5_spill] sm:$0xff] %v9899_v9 }
 0x109   : > { %7160 = vmatprep.mubr.f32.mxu1 %v830_v47  ;;  %v831_v26 = vsub.f32 %v9770_v32, %v830_v47  ;;  %v9815_v47 = vpack.c.bf16 %v888_v27, %v881_v38  ;;  %v909_v38 = vand.u32 4294901760, %v908_v55 }
 0x10a   : > { %7161 = vmatmul.mubr.f32.vlgmr.msra.gmra.mrb[2].mxu1 %v840_v17  ;;  %v842_v3 = vand.u32 4294901760, %v841_v61  ;;  %v9804_v17 = vsub.f32 %v9641_v54, %v10599_v16  ;;  %v9817_v61 = vpack.c.bf16 %v900_v45, %v893_v60  ;;  %v902_v54 = vand.u32 4294901760, %v901_v57 }
 0x10b   : > { %8396 = vmatpush3.bf16.msra.mxu1 %v9706_v18  ;;  %7195 = vmatprep.mubr.f32.mxu1 %v9754_v30  ;;  %v832_v49 = vand.u32 4294901760, %v831_v26  ;;  %v928_v26 = vand.u32 4294901760, %v9809_v23  ;;  %v9830_v45 = vpack.c.bf16 %v914_v29, %v907_v50  ;;  %v916_v27 = vand.u32 4294901760, %v915_v39 }
 0x10c   : > { %8398 = vmatprep.subr.bf16.mxu1 %v9784_v35  ;;  %v921_v42 = vand.u32 4294901760, %v9804_v17  ;;  %v9828_v60 = vpack.c.bf16 %v902_v54, %v895_v37  ;;  %v9908_v37 = vpack.c.bf16 %v9789_v15, %v9781_v48  ;;  %v9913_v54 = vsub.f32 %v2617_v58, %v2620_v8 }
 0x10d   : > { %7055 = vmatprep.mubr.f32.mxu0 %v832_v49  ;;  %v929_v52 = vsub.f32 %v9809_v23, %v928_v26  ;;  %v9840_v57 = vpack.c.bf16 %v916_v27, %v909_v38  ;;  %v9922_v48 = vpack.c.bf16 %v9809_v23, %v9804_v17 }
 0x10e   : > { %7056 = vmatmul.mubr.f32.vlgmr.msra.gmra.mrb[2].mxu0 %v842_v3  ;;  %v922_v49 = vsub.f32 %v9804_v17, %v921_v42  ;;  %v9842_v50 = vpack.c.bf16 %v928_v26, %v921_v42  ;;  %v2709_v15 = vand.u32 4294901760, %v9913_v54 }
 0x10f   : > { %8300 = vmatpush3.bf16.msra.mxu0 %v9709_v25  ;;  %8400 = vmatpush3.bf16.msra.mxu1 %v9784_v35  ;;  %v930_v29 = vand.u32 4294901760, %v929_v52 }
 0x110   : > { %7090 = vmatprep.mubr.f32.mxu0 %v9754_v30  ;;  %8302 = vmatprep.subr.bf16.mxu0 %v9792_v36  ;;  %10601 = vst [vmem:[#allocation4_spill] sm:$0xff] %v9842_v50  ;;  %v923_v3 = vand.u32 4294901760, %v922_v49  ;;  %v2710_v17 = vsub.f32 %v9913_v54, %v2709_v15 }
 0x111   : > { %8402 = vmatprep.subr.bf16.mxu1 %v9811_v44 }
 0x112   : > { %v9848_v16 = vpack.c.bf16 %v930_v29, %v923_v3  ;;  %v2711_v52 = vand.u32 4294901760, %v2710_v17 }
 0x113   : > { %8304 = vmatpush3.bf16.msra.mxu0 %v9792_v36  ;;  %8404 = vmatpush3.bf16.msra.mxu1 %v9811_v44 }
 0x114   : > { %8306 = vmatprep.subr.bf16.mxu0 %v9815_v47  ;;  %8406 = vmatprep.subr.bf16.mxu1 %v9817_v61 }
 0x117   : > { %8308 = vmatpush3.bf16.msra.mxu0 %v9815_v47  ;;  %8408 = vmatpush3.bf16.msra.mxu1 %v9817_v61 }
 0x118   : > { %8310 = vmatprep.subr.bf16.mxu0 %v9828_v60  ;;  %8410 = vmatprep.subr.bf16.mxu1 %v9830_v45 }
 0x11b   : > { %8312 = vmatpush3.bf16.msra.mxu0 %v9828_v60  ;;  %8412 = vmatpush3.bf16.msra.mxu1 %v9830_v45 }
 0x11c   : > { %8314 = vmatprep.subr.bf16.mxu0 %v9840_v57  ;;  %8414 = vmatprep.subr.bf16.mxu1 %v9842_v50 }
 0x11f   : > { %8316 = vmatpush3.bf16.msra.mxu0 %v9840_v57  ;;  %8416 = vmatpush3.bf16.msra.mxu1 %v9842_v50 }
 0x120   : > { %8318 = vmatprep.subr.bf16.mxu0 %v9848_v16  ;;  %8418 = vmatprep.subr.bf16.mxu1 %v9712_v33 }
 0x123   : > { %8320 = vmatpush3.bf16.msra.mxu0 %v9848_v16  ;;  %8420 = vmatpush3.bf16.msra.mxu1 %v9712_v33 }
 0x124   : > { %8322 = vmatprep.subr.bf16.mxu0 %v9716_v24  ;;  %8422 = vmatprep.subr.bf16.mxu1 %v9714_v21 }
 0x127   : > { %8324 = vmatpush3.bf16.msra.mxu0 %v9716_v24  ;;  %8424 = vmatpush3.bf16.msra.mxu1 %v9714_v21 }
 0x128   : > { %8326 = vmatprep.subr.bf16.mxu0 %v9718_v62  ;;  %8426 = vmatprep.subr.bf16.mxu1 %v9554_v34 }
 0x12a   : > { %7196 = vmatmul.mubr.f32.vlgmr.msra.gmra.mrb[2].mxu1 %v9749_v28 }
 0x12b   : > { %8328 = vmatpush3.bf16.msra.mxu0 %v9718_v62  ;;  %8428 = vmatpush3.bf16.msra.mxu1 %v9554_v34 }
 0x12c   : > { %7230 = vmatprep.mubr.f32.mxu1 %v9754_v30  ;;  %8330 = vmatprep.subr.bf16.mxu0 %v9720_v63  ;;  %v9879_v30 = vpack.c.bf16 %v9746_v14, %v9741_v12  ;;  %v9896_v12 = vpack.c.bf16 %v9764_v43, %v9759_v40  ;;  %v2623_v14 = vand.u32 4294901760, %v2618_v53  ;;  %v1432_v40 = vand.u32 4294901760, %v9899_v9 }
 0x12d   : > { %8430 = vmatprep.subr.bf16.mxu1 %v9588_v41 }
 0x12e   : > { %7091 = vmatmul.mubr.f32.vlgmr.msra.gmra.mrb[2].mxu0 %v9749_v28  ;;  %v9915_v55 = vsub.f32 %v2618_v53, %v2623_v14  ;;  %v1520_v42 = vsub.f32 %v9899_v9, %v1432_v40  ;;  %v8673_v49 = vpack.c.bf16 %v2623_v14, %v2620_v8 }
 0x12f   : > { %8332 = vmatpush3.bf16.msra.mxu0 %v9720_v63  ;;  %7125 = vmatprep.mubr.f32.mxu0 %v9770_v32  ;;  %v9901_v32 = vld [vmem:[%s211_s13 + $0x8] sm:$0xff] }
 0x130   : > { %8432 = vmatpush3.bf16.msra.mxu1 %v9588_v41  ;;  %8334 = vmatprep.subr.bf16.mxu0 %v9869_v22  ;;  %10603 = vst [vmem:[#allocation6_spill] sm:$0xff] %v9901_v32  ;;  %v1435_v43 = vand.u32 4294901760, %v9901_v32  ;;  %v2716_v39 = vand.u32 4294901760, %v9915_v55  ;;  %v1521_v38 = vand.u32 4294901760, %v1520_v42  ;;  %v8681_v14 = vpack.c.bf16 %v9915_v55, %v9913_v54 }
 0x131   : > { %8434 = vmatprep.subr.bf16.mxu1 %v9612_v46 }
 0x132   : > { %v1527_v26 = vsub.f32 %v9901_v32, %v1435_v43  ;;  %v2717_v23 = vsub.f32 %v9915_v55, %v2716_v39  ;;  %v1522_v29 = vsub.f32 %v1520_v42, %v1521_v38  ;;  %v8457_v53 = vpack.c.bf16 %v1435_v43, %v1432_v40 }
 0x133   : > { %8336 = vmatpush3.bf16.msra.mxu0 %v9869_v22 }
 0x134   : > { %8436 = vmatpush3.bf16.msra.mxu1 %v9612_v46  ;;  %8338 = vmatprep.subr.bf16.mxu0 %v9879_v30  ;;  %v1528_v27 = vand.u32 4294901760, %v1527_v26  ;;  %v2718_v3 = vand.u32 4294901760, %v2717_v23  ;;  %v1523_v9 = vand.u32 4294901760, %v1522_v29 }
 0x135   : > { %8438 = vmatprep.subr.bf16.mxu1 %v9634_v51 }
 0x136   : > { %v1529_v58 = vsub.f32 %v1527_v26, %v1528_v27  ;;  %v8677_v32 = vpack.c.bf16 %v2718_v3, %v2711_v52 }
 0x137   : > { %8340 = vmatpush3.bf16.msra.mxu0 %v9879_v30 }
 0x138   : > { %8440 = vmatpush3.bf16.msra.mxu1 %v9634_v51  ;;  %8342 = vmatprep.subr.bf16.mxu0 %v9896_v12  ;;  %v1530_v21 = vand.u32 4294901760, %v1529_v58 }
 0x139   : > { %8442 = vmatprep.subr.bf16.mxu1 %v9656_v56 }
 0x13a   : > { %v8461_v8 = vpack.c.bf16 %v1530_v21, %v1523_v9  ;;  %v8689_v21 = vpack.c.bf16 %v2716_v39, %v2709_v15 }
 0x13b   : > { %8344 = vmatpush3.bf16.msra.mxu0 %v9896_v12 }
 0x13c   : > { %8444 = vmatpush3.bf16.msra.mxu1 %v9656_v56  ;;  %8346 = vmatprep.subr.bf16.mxu0 %v9908_v37 }
 0x13d   : > { %8446 = vmatprep.subr.bf16.mxu1 %v9668_v59 }
 0x13f   : > { %8348 = vmatpush3.bf16.msra.mxu0 %v9908_v37 }
 0x140   : > { %8448 = vmatpush3.bf16.msra.mxu1 %v9668_v59  ;;  %8350 = vmatprep.subr.bf16.mxu0 %v9922_v48 }
 0x141   : > { %8450 = vmatprep.subr.bf16.mxu1 %v9682_v0 }
 0x143   : > { %8352 = vmatpush3.bf16.msra.mxu0 %v9922_v48 }
 0x144   : > { %8452 = vmatpush3.bf16.msra.mxu1 %v9682_v0  ;;  %8354 = vmatprep.subr.bf16.mxu0 %v9722_v1 }
 0x145   : > { %8454 = vmatprep.subr.bf16.mxu1 %v9694_v13 }
 0x147   : > { %8356 = vmatpush3.bf16.msra.mxu0 %v9722_v1 }
 0x148   : > { %8456 = vmatpush3.bf16.msra.mxu1 %v9694_v13  ;;  %8358 = vmatprep.subr.bf16.mxu0 %v9724_v2 }
 0x149   : > { %8674 = vmatprep.subr.bf16.mxu1 %v8673_v49 }
 0x14b   : > { %7231 = vmatmul.mubr.f32.vlgmr.msra.gmra.mrb[2].mxu1 %v9749_v28  ;;  %8360 = vmatpush3.bf16.msra.mxu0 %v9724_v2  ;;  %v8465_v28 = vpack.c.bf16 %v1527_v26, %v1520_v42 }
 0x14c   : > { %8676 = vmatpush3.bf16.msra.mxu1 %v8673_v49  ;;  %7489 = vmatprep.mubr.f32.mxu1 %v9529_v19 }
 0x14d   : > { %8458 = vmatprep.subr.bf16.mxu0 %v8457_v53  ;;  %8678 = vmatprep.subr.bf16.mxu1 %v8677_v32 }
 0x14e   : > { %7126 = vmatmul.mubr.f32.vlgmr.msra.gmra.mrb[2].mxu0 %v9767_v31  ;;  %v8473_v31 = vpack.c.bf16 %v1528_v27, %v1521_v38 }
 0x14f   : > { %7490 = vmatmul.mubr.f32.vlgmr.msra.gmra.mrb[4].mxu1 %v9531_v20  ;;  %8460 = vmatpush3.bf16.msra.mxu0 %v8457_v53 }
 0x150   : > { %7237 = vmatprep.mubr.f32.mxu0 %v9529_v19  ;;  %8680 = vmatpush3.bf16.msra.mxu1 %v8677_v32 }
 0x151   : > { %7496 = vmatprep.mubr.f32.mxu1 %v9490_v4  ;;  %8462 = vmatprep.subr.bf16.mxu0 %v8461_v8 }
 0x152   : > { %7238 = vmatmul.mubr.f32.vlgmr.msra.gmra.mrb[4].mxu0 %v9531_v20  ;;  %8682 = vmatprep.subr.bf16.mxu1 %v8681_v14 }
 0x153   : > { %8464 = vmatpush3.bf16.msra.mxu0 %v8461_v8  ;;  %7244 = vmatprep.mubr.f32.mxu0 %v9490_v4 }
 0x154   : > { %8466 = vmatprep.subr.bf16.mxu0 %v8465_v28 }
 0x157   : > { %7497 = vmatmul.mubr.f32.vlgmr.msra.gmra.mrb[4].mxu1 %v9492_v5 }
 0x158   : > { %8684 = vmatpush3.bf16.msra.mxu1 %v8681_v14  ;;  %7503 = vmatprep.mubr.f32.mxu1 %v9496_v6 }
 0x159   : > { %8686 = vmatprep.subr.bf16.mxu1 %v8673_v49 }
 0x15a   : > { %7245 = vmatmul.mubr.f32.vlgmr.msra.gmra.mrb[4].mxu0 %v9492_v5 }
 0x15b   : > { %8468 = vmatpush3.bf16.msra.mxu0 %v8465_v28  ;;  %7251 = vmatprep.mubr.f32.mxu0 %v9496_v6 }
 0x15c   : > { %8470 = vmatprep.subr.bf16.mxu0 %v8457_v53 }
 0x15f   : > { %7504 = vmatmul.mubr.f32.vlgmr.msra.gmra.mrb[4].mxu1 %v9499_v7 }
 0x160   : > { %8688 = vmatpush3.bf16.msra.mxu1 %v8673_v49  ;;  %7510 = vmatprep.mubr.f32.mxu1 %v9515_v10 }
 0x161   : > { %8690 = vmatprep.subr.bf16.mxu1 %v8689_v21 }
 0x162   : > { %7252 = vmatmul.mubr.f32.vlgmr.msra.gmra.mrb[4].mxu0 %v9499_v7 }
 0x163   : > { %8472 = vmatpush3.bf16.msra.mxu0 %v8457_v53  ;;  %7258 = vmatprep.mubr.f32.mxu0 %v9515_v10 }
 0x164   : > { %8474 = vmatprep.subr.bf16.mxu0 %v8473_v31 }
 0x167   : > { %7511 = vmatmul.mubr.f32.vlgmr.msra.gmra.mrb[4].mxu1 %v9518_v11 }
 0x168   : > { %8692 = vmatpush3.bf16.msra.mxu1 %v8689_v21  ;;  %7517 = vmatprep.mubr.f32.mxu1 %v9490_v4 }
 0x169   : > { %8694 = vmatprep.subr.bf16.mxu1 %v8673_v49 }
 0x16a   : > { %7259 = vmatmul.mubr.f32.vlgmr.msra.gmra.mrb[4].mxu0 %v9518_v11 }
 0x16b   : > { %8476 = vmatpush3.bf16.msra.mxu0 %v8473_v31  ;;  %7265 = vmatprep.mubr.f32.mxu0 %v9490_v4 }
 0x16c   : > { %8478 = vmatprep.subr.bf16.mxu0 %v8457_v53 }
 0x16f   : > { %7518 = vmatmul.mubr.f32.vlgmr.msra.gmra.mrb[4].mxu1 %v9492_v5 }
 0x170   : > { %8696 = vmatpush3.bf16.msra.mxu1 %v8673_v49  ;;  %7524 = vmatprep.mubr.f32.mxu1 %v9490_v4 }
 0x171   : > { %8698 = vmatprep.subr.bf16.mxu1 %v9554_v34 }
 0x172   : > { %7266 = vmatmul.mubr.f32.vlgmr.msra.gmra.mrb[4].mxu0 %v9492_v5 }
 0x173   : > { %8480 = vmatpush3.bf16.msra.mxu0 %v8457_v53  ;;  %7272 = vmatprep.mubr.f32.mxu0 %v9490_v4 }
 0x174   : > { %8482 = vmatprep.subr.bf16.mxu0 %v9554_v34 }
 0x177   : > { %7525 = vmatmul.mubr.f32.vlgmr.msra.gmra.mrb[4].mxu1 %v9492_v5 }
 0x178   : > { %8700 = vmatpush3.bf16.msra.mxu1 %v9554_v34 }
 0x179   : > { %8702 = vmatprep.subr.bf16.mxu1 %v9588_v41 }
 0x17a   : > { %7273 = vmatmul.mubr.f32.vlgmr.msra.gmra.mrb[4].mxu0 %v9492_v5 }
 0x17b   : > { %8484 = vmatpush3.bf16.msra.mxu0 %v9554_v34 }
 0x17c   : > { %8704 = vmatpush3.bf16.msra.mxu1 %v9588_v41  ;;  %8486 = vmatprep.subr.bf16.mxu0 %v9588_v41 }
 0x17d   : > { %8706 = vmatprep.subr.bf16.mxu1 %v9612_v46 }
 0x17f   : > { %8488 = vmatpush3.bf16.msra.mxu0 %v9588_v41 }
 0x180   : > { %8708 = vmatpush3.bf16.msra.mxu1 %v9612_v46  ;;  %8490 = vmatprep.subr.bf16.mxu0 %v9612_v46 }
 0x181   : > { %8710 = vmatprep.subr.bf16.mxu1 %v9634_v51 }
 0x183   : > { %8492 = vmatpush3.bf16.msra.mxu0 %v9612_v46 }
 0x184   : > { %8712 = vmatpush3.bf16.msra.mxu1 %v9634_v51  ;;  %8494 = vmatprep.subr.bf16.mxu0 %v9634_v51 }
 0x185   : > { %8714 = vmatprep.subr.bf16.mxu1 %v9656_v56 }
 0x187   : > { %8496 = vmatpush3.bf16.msra.mxu0 %v9634_v51 }
 0x188   : > { %8716 = vmatpush3.bf16.msra.mxu1 %v9656_v56  ;;  %8498 = vmatprep.subr.bf16.mxu0 %v9656_v56 }
 0x189   : > { %8718 = vmatprep.subr.bf16.mxu1 %v9668_v59 }
 0x18b   : > { %8500 = vmatpush3.bf16.msra.mxu0 %v9656_v56 }
 0x18c   : > { %8720 = vmatpush3.bf16.msra.mxu1 %v9668_v59  ;;  %8502 = vmatprep.subr.bf16.mxu0 %v9668_v59 }
 0x18d   : > { %8722 = vmatprep.subr.bf16.mxu1 %v9682_v0 }
 0x18f   : > { %8504 = vmatpush3.bf16.msra.mxu0 %v9668_v59 }
 0x190   : > { %8724 = vmatpush3.bf16.msra.mxu1 %v9682_v0  ;;  %8506 = vmatprep.subr.bf16.mxu0 %v9682_v0 }
 0x191   : > { %8726 = vmatprep.subr.bf16.mxu1 %v9694_v13 }
 0x193   : > { %8508 = vmatpush3.bf16.msra.mxu0 %v9682_v0 }
 0x194   : > { %8728 = vmatpush3.bf16.msra.mxu1 %v9694_v13  ;;  %8510 = vmatprep.subr.bf16.mxu0 %v9694_v13 }
 0x195   : > { %8730 = vmatprep.subr.bf16.mxu1 %v9709_v25 }
 0x197   : > { %8512 = vmatpush3.bf16.msra.mxu0 %v9694_v13 }
 0x198   : > { %8514 = vmatprep.subr.bf16.mxu0 %v9709_v25 }
 0x21e   : > { %v7232_v9 = vpop.f32.mrb[2].mxu1 }
 0x21f   : > { %v1421_v32 = vpop.f32.mrb[3].mxu1 }
 0x221   : > { %v7127_v40 = vpop.f32.mrb[2].mxu0 }
 0x222   : > { %v10005_v43 = vadd.f32 %v7232_v9, %v7127_v40  ;;  %v1105_v54 = vpop.f32.mrb[3].mxu0 }
 0x223   : > { %v10007_v55 = vadd.f32 %v1421_v32, %v1105_v54 }
 0x24a   : > { %v7526_v15 = vpop.f32.mrb[4].mxu1 }
 0x24b   : > { %v10009_v39 = vand.u32 4294901760, %v7526_v15  ;;  %v3111_v42 = vpop.f32.mrb[5].mxu1 }
 0x24c   : > { %v10011_v26 = vand.u32 4294901760, %v3111_v42 }
 0x24d   : > { %v10014_v17 = vsub.f32 %v7526_v15, %v10009_v39  ;;  %v7274_v23 = vpop.f32.mrb[4].mxu0 }
 0x24e   : > { %v10017_v38 = vsub.f32 %v3111_v42, %v10011_v26  ;;  %v10019_v27 = vand.u32 4294901760, %v7274_v23  ;;  %v1923_v49 = vpop.f32.mrb[5].mxu0  ;;  %v10604_v42 = vld [vmem:[#allocation3_spill] sm:$0xff] }
 0x24f   : > { %v3214_v52 = vand.u32 4294901760, %v10014_v17  ;;  %v10022_v3 = vand.u32 4294901760, %v1923_v49 }
 0x250   : > { %v3204_v29 = vand.u32 4294901760, %v10017_v38  ;;  %v10026_v58 = vsub.f32 %v7274_v23, %v10019_v27  ;;  %v10605_v23 = vld [vmem:[#allocation5_spill] sm:$0xff] }
 0x251   : > { %v3215_v53 = vsub.f32 %v10014_v17, %v3214_v52  ;;  %v10032_v8 = vsub.f32 %v1923_v49, %v10022_v3  ;;  %v10606_v49 = vld [vmem:[#allocation6_spill] sm:$0xff] }
 0x252   : > { %v2026_v14 = vand.u32 4294901760, %v10026_v58  ;;  %v3205_v28 = vsub.f32 %v10017_v38, %v3204_v29 }
 0x253   : > { %v2016_v21 = vand.u32 4294901760, %v10032_v8  ;;  %v3216_v32 = vand.u32 4294901760, %v3215_v53  ;;  %v3806_v53 = vmul.f32 %v10606_v49, %v10606_v49 }
 0x254   : > { %v2027_v31 = vsub.f32 %v10026_v58, %v2026_v14  ;;  %v3206_v9 = vand.u32 4294901760, %v3205_v28 }
 0x255   : > { %v2017_v40 = vsub.f32 %v10032_v8, %v2016_v21 }
 0x256   : > { %7559 = vmatprep.mubr.f32.mxu1 %v3206_v9  ;;  %v2028_v15 = vand.u32 4294901760, %v2027_v31 }
 0x257   : > { %7560 = vmatmul.mubr.f32.vlgmr.msra.gmra.mrb[6].mxu1 %v3216_v32  ;;  %v2018_v54 = vand.u32 4294901760, %v2017_v40 }
 0x258   : > { %8732 = vmatpush3.bf16.msra.mxu1 %v9709_v25  ;;  %7594 = vmatprep.mubr.f32.mxu1 %v10011_v26 }
 0x259   : > { %7307 = vmatprep.mubr.f32.mxu0 %v2018_v54  ;;  %8734 = vmatprep.subr.bf16.mxu1 %v9792_v36 }
 0x25a   : > { %7308 = vmatmul.mubr.f32.vlgmr.msra.gmra.mrb[6].mxu0 %v2028_v15 }
 0x25b   : > { %8516 = vmatpush3.bf16.msra.mxu0 %v9709_v25  ;;  %7342 = vmatprep.mubr.f32.mxu0 %v10022_v3 }
 0x25c   : > { %8736 = vmatpush3.bf16.msra.mxu1 %v9792_v36  ;;  %8518 = vmatprep.subr.bf16.mxu0 %v9792_v36 }
 0x25d   : > { %8738 = vmatprep.subr.bf16.mxu1 %v9815_v47 }
 0x25f   : > { %8520 = vmatpush3.bf16.msra.mxu0 %v9792_v36 }
 0x260   : > { %8740 = vmatpush3.bf16.msra.mxu1 %v9815_v47  ;;  %8522 = vmatprep.subr.bf16.mxu0 %v9815_v47 }
 0x261   : > { %8742 = vmatprep.subr.bf16.mxu1 %v9828_v60 }
 0x263   : > { %8524 = vmatpush3.bf16.msra.mxu0 %v9815_v47 }
 0x264   : > { %8744 = vmatpush3.bf16.msra.mxu1 %v9828_v60  ;;  %8526 = vmatprep.subr.bf16.mxu0 %v9828_v60 }
 0x265   : > { %8746 = vmatprep.subr.bf16.mxu1 %v9840_v57 }
 0x267   : > { %8528 = vmatpush3.bf16.msra.mxu0 %v9828_v60 }
 0x268   : > { %8748 = vmatpush3.bf16.msra.mxu1 %v9840_v57  ;;  %8530 = vmatprep.subr.bf16.mxu0 %v9840_v57 }
 0x269   : > { %8750 = vmatprep.subr.bf16.mxu1 %v9848_v16 }
 0x26b   : > { %8532 = vmatpush3.bf16.msra.mxu0 %v9840_v57 }
 0x26c   : > { %8752 = vmatpush3.bf16.msra.mxu1 %v9848_v16  ;;  %8534 = vmatprep.subr.bf16.mxu0 %v9848_v16 }
 0x26d   : > { %8754 = vmatprep.subr.bf16.mxu1 %v9716_v24 }
 0x26f   : > { %8536 = vmatpush3.bf16.msra.mxu0 %v9848_v16 }
 0x270   : > { %8756 = vmatpush3.bf16.msra.mxu1 %v9716_v24  ;;  %8538 = vmatprep.subr.bf16.mxu0 %v9716_v24 }
 0x271   : > { %8758 = vmatprep.subr.bf16.mxu1 %v9718_v62 }
 0x273   : > { %8540 = vmatpush3.bf16.msra.mxu0 %v9716_v24 }
 0x274   : > { %8760 = vmatpush3.bf16.msra.mxu1 %v9718_v62  ;;  %8542 = vmatprep.subr.bf16.mxu0 %v9718_v62 }
 0x275   : > { %8762 = vmatprep.subr.bf16.mxu1 %v9720_v63 }
 0x277   : > { %7595 = vmatmul.mubr.f32.vlgmr.msra.gmra.mrb[6].mxu1 %v10009_v39  ;;  %8544 = vmatpush3.bf16.msra.mxu0 %v9718_v62 }
 0x278   : > { %8764 = vmatpush3.bf16.msra.mxu1 %v9720_v63  ;;  %7629 = vmatprep.mubr.f32.mxu1 %v10017_v38 }
 0x279   : > { %8546 = vmatprep.subr.bf16.mxu0 %v9720_v63  ;;  %8766 = vmatprep.subr.bf16.mxu1 %v9869_v22 }
 0x27a   : > { %7343 = vmatmul.mubr.f32.vlgmr.msra.gmra.mrb[6].mxu0 %v10019_v27 }
 0x27b   : > { %8548 = vmatpush3.bf16.msra.mxu0 %v9720_v63  ;;  %7377 = vmatprep.mubr.f32.mxu0 %v10032_v8 }
 0x27c   : > { %8768 = vmatpush3.bf16.msra.mxu1 %v9869_v22  ;;  %8550 = vmatprep.subr.bf16.mxu0 %v9869_v22 }
 0x27d   : > { %8770 = vmatprep.subr.bf16.mxu1 %v9879_v30 }
 0x27f   : > { %8552 = vmatpush3.bf16.msra.mxu0 %v9869_v22 }
 0x280   : > { %8772 = vmatpush3.bf16.msra.mxu1 %v9879_v30  ;;  %8554 = vmatprep.subr.bf16.mxu0 %v9879_v30 }
 0x281   : > { %8774 = vmatprep.subr.bf16.mxu1 %v9896_v12 }
 0x283   : > { %8556 = vmatpush3.bf16.msra.mxu0 %v9879_v30 }
 0x284   : > { %8776 = vmatpush3.bf16.msra.mxu1 %v9896_v12  ;;  %8558 = vmatprep.subr.bf16.mxu0 %v9896_v12 }
 0x285   : > { %8778 = vmatprep.subr.bf16.mxu1 %v9908_v37 }
 0x287   : > { %8560 = vmatpush3.bf16.msra.mxu0 %v9896_v12 }
 0x288   : > { %8780 = vmatpush3.bf16.msra.mxu1 %v9908_v37  ;;  %8562 = vmatprep.subr.bf16.mxu0 %v9908_v37 }
 0x289   : > { %8782 = vmatprep.subr.bf16.mxu1 %v9922_v48 }
 0x28b   : > { %8564 = vmatpush3.bf16.msra.mxu0 %v9908_v37 }
 0x28c   : > { %8784 = vmatpush3.bf16.msra.mxu1 %v9922_v48  ;;  %8566 = vmatprep.subr.bf16.mxu0 %v9922_v48 }
 0x28d   : > { %8786 = vmatprep.subr.bf16.mxu1 %v9722_v1 }
 0x28f   : > { %8568 = vmatpush3.bf16.msra.mxu0 %v9922_v48 }
 0x290   : > { %8788 = vmatpush3.bf16.msra.mxu1 %v9722_v1  ;;  %8570 = vmatprep.subr.bf16.mxu0 %v9722_v1 }
 0x291   : > { %8790 = vmatprep.subr.bf16.mxu1 %v9724_v2 }
 0x293   : > { %8572 = vmatpush3.bf16.msra.mxu0 %v9722_v1 }
 0x294   : > { %8792 = vmatpush3.bf16.msra.mxu1 %v9724_v2  ;;  %8574 = vmatprep.subr.bf16.mxu0 %v9724_v2 }
 0x295   : > { %8794 = vmatprep.subr.bf16.mxu1 %v9554_v34 }
 0x297   : > { %7630 = vmatmul.mubr.f32.vlgmr.msra.gmra.mrb[6].mxu1 %v10014_v17  ;;  %8576 = vmatpush3.bf16.msra.mxu0 %v9724_v2  ;;  %v9435_v17 = vld [vmem:[%s9506_s25] sm:$0xff] }
 0x298   : > { %8796 = vmatpush3.bf16.msra.mxu1 %v9554_v34  ;;  %7664 = vmatprep.mubr.f32.mxu1 %v3204_v29  ;;  %v4993_v38 = vmul.f32 %v9435_v17, %v10605_v23 }
 0x299   : > { %8578 = vmatprep.subr.bf16.mxu0 %v9554_v34  ;;  %8798 = vmatprep.subr.bf16.mxu1 %v9588_v41 }
 0x29a   : > { %7378 = vmatmul.mubr.f32.vlgmr.msra.gmra.mrb[6].mxu0 %v10026_v58  ;;  %v3805_v58 = vmul.f32 %v10605_v23, %v10605_v23 }
 0x29b   : > { %8580 = vmatpush3.bf16.msra.mxu0 %v9554_v34  ;;  %7412 = vmatprep.mubr.f32.mxu0 %v2016_v21 }
 0x29c   : > { %8800 = vmatpush3.bf16.msra.mxu1 %v9588_v41  ;;  %8582 = vmatprep.subr.bf16.mxu0 %v9588_v41  ;;  %v3808_v8 = vand.u32 4294901760, %v3805_v58 }
 0x29d   : > { %8802 = vmatprep.subr.bf16.mxu1 %v9612_v46 }
 0x29e   : > { %v3896_v32 = vsub.f32 %v3805_v58, %v3808_v8 }
 0x29f   : > { %8584 = vmatpush3.bf16.msra.mxu0 %v9588_v41 }
 0x2a0   : > { %8804 = vmatpush3.bf16.msra.mxu1 %v9612_v46  ;;  %8586 = vmatprep.subr.bf16.mxu0 %v9612_v46  ;;  %v3897_v17 = vand.u32 4294901760, %v3896_v32 }
 0x2a1   : > { %8806 = vmatprep.subr.bf16.mxu1 %v9634_v51 }
 0x2a3   : > { %8588 = vmatpush3.bf16.msra.mxu0 %v9612_v46 }
 0x2a4   : > { %8808 = vmatpush3.bf16.msra.mxu1 %v9634_v51  ;;  %8590 = vmatprep.subr.bf16.mxu0 %v9634_v51 }
 0x2a5   : > { %8810 = vmatprep.subr.bf16.mxu1 %v9656_v56 }
 0x2a7   : > { %8592 = vmatpush3.bf16.msra.mxu0 %v9634_v51 }
 0x2a8   : > { %8812 = vmatpush3.bf16.msra.mxu1 %v9656_v56  ;;  %8594 = vmatprep.subr.bf16.mxu0 %v9656_v56 }
 0x2a9   : > { %8814 = vmatprep.subr.bf16.mxu1 %v9668_v59 }
 0x2ab   : > { %8596 = vmatpush3.bf16.msra.mxu0 %v9656_v56 }
 0x2ac   : > { %8816 = vmatpush3.bf16.msra.mxu1 %v9668_v59  ;;  %8598 = vmatprep.subr.bf16.mxu0 %v9668_v59 }
 0x2ad   : > { %8818 = vmatprep.subr.bf16.mxu1 %v9682_v0 }
 0x2af   : > { %8600 = vmatpush3.bf16.msra.mxu0 %v9668_v59 }
 0x2b0   : > { %8820 = vmatpush3.bf16.msra.mxu1 %v9682_v0  ;;  %8602 = vmatprep.subr.bf16.mxu0 %v9682_v0 }
 0x2b1   : > { %8822 = vmatprep.subr.bf16.mxu1 %v9694_v13 }
 0x2b3   : > { %8604 = vmatpush3.bf16.msra.mxu0 %v9682_v0 }
 0x2b4   : > { %8824 = vmatpush3.bf16.msra.mxu1 %v9694_v13  ;;  %8606 = vmatprep.subr.bf16.mxu0 %v9694_v13 }
 0x2b5   : > { %8826 = vmatprep.subr.bf16.mxu1 %v9706_v18 }
 0x2b7   : > { %7665 = vmatmul.mubr.f32.vlgmr.msra.gmra.mrb[6].mxu1 %v3214_v52  ;;  %8608 = vmatpush3.bf16.msra.mxu0 %v9694_v13 }
 0x2b8   : > { %8828 = vmatpush3.bf16.msra.mxu1 %v9706_v18  ;;  %7699 = vmatprep.mubr.f32.mxu1 %v10011_v26 }
 0x2b9   : > { %8610 = vmatprep.subr.bf16.mxu0 %v9706_v18  ;;  %8830 = vmatprep.subr.bf16.mxu1 %v9784_v35 }
 0x2ba   : > { %7413 = vmatmul.mubr.f32.vlgmr.msra.gmra.mrb[6].mxu0 %v2026_v14  ;;  %v3811_v14 = vand.u32 4294901760, %v3806_v53 }
 0x2bb   : > { %8612 = vmatpush3.bf16.msra.mxu0 %v9706_v18  ;;  %7447 = vmatprep.mubr.f32.mxu0 %v10022_v3 }
 0x2bc   : > { %8832 = vmatpush3.bf16.msra.mxu1 %v9784_v35  ;;  %8614 = vmatprep.subr.bf16.mxu0 %v9784_v35  ;;  %v3903_v40 = vsub.f32 %v3806_v53, %v3811_v14  ;;  %v8889_v53 = vpack.c.bf16 %v3811_v14, %v3808_v8 }
 0x2bd   : > { %8834 = vmatprep.subr.bf16.mxu1 %v9811_v44 }
 0x2be   : > { %v3904_v23 = vand.u32 4294901760, %v3903_v40 }
 0x2bf   : > { %8616 = vmatpush3.bf16.msra.mxu0 %v9784_v35 }
 0x2c0   : > { %8836 = vmatpush3.bf16.msra.mxu1 %v9811_v44  ;;  %8618 = vmatprep.subr.bf16.mxu0 %v9811_v44  ;;  %v3905_v58 = vsub.f32 %v3903_v40, %v3904_v23 }
 0x2c1   : > { %8838 = vmatprep.subr.bf16.mxu1 %v9817_v61 }
 0x2c3   : > { %8620 = vmatpush3.bf16.msra.mxu0 %v9811_v44 }
 0x2c4   : > { %8840 = vmatpush3.bf16.msra.mxu1 %v9817_v61  ;;  %8622 = vmatprep.subr.bf16.mxu0 %v9817_v61 }
 0x2c5   : > { %8842 = vmatprep.subr.bf16.mxu1 %v9830_v45 }
 0x2c7   : > { %8624 = vmatpush3.bf16.msra.mxu0 %v9817_v61 }
 0x2c8   : > { %8844 = vmatpush3.bf16.msra.mxu1 %v9830_v45  ;;  %8626 = vmatprep.subr.bf16.mxu0 %v9830_v45 }
 0x2c9   : > { %8846 = vmatprep.subr.bf16.mxu1 %v9842_v50 }
 0x2cb   : > { %8628 = vmatpush3.bf16.msra.mxu0 %v9830_v45 }
 0x2cc   : > { %8848 = vmatpush3.bf16.msra.mxu1 %v9842_v50  ;;  %8630 = vmatprep.subr.bf16.mxu0 %v9842_v50 }
 0x2cd   : > { %8850 = vmatprep.subr.bf16.mxu1 %v9712_v33 }
 0x2cf   : > { %8632 = vmatpush3.bf16.msra.mxu0 %v9842_v50  ;;  %v3906_v50 = vand.u32 4294901760, %v3905_v58 }
 0x2d0   : > { %8852 = vmatpush3.bf16.msra.mxu1 %v9712_v33  ;;  %8634 = vmatprep.subr.bf16.mxu0 %v9712_v33 }
 0x2d1   : > { %8854 = vmatprep.subr.bf16.mxu1 %v10604_v42 }
 0x2d3   : > { %8636 = vmatpush3.bf16.msra.mxu0 %v9712_v33 }
 0x2d4   : > { %8856 = vmatpush3.bf16.msra.mxu1 %v10604_v42  ;;  %8638 = vmatprep.subr.bf16.mxu0 %v10604_v42 }
 0x2d5   : > { %8858 = vmatprep.subr.bf16.mxu1 %v9554_v34 }
 0x2d7   : > { %7700 = vmatmul.mubr.f32.vlgmr.msra.gmra.mrb[6].mxu1 %v10009_v39  ;;  %8640 = vmatpush3.bf16.msra.mxu0 %v10604_v42 }
 0x2d8   : > { %8860 = vmatpush3.bf16.msra.mxu1 %v9554_v34  ;;  %7734 = vmatprep.mubr.f32.mxu1 %v10011_v26  ;;  %v9436_v26 = vld [vmem:[%s9506_s25 + $0x8] sm:$0xff]  ;;  %s6218_s25 = ssub.s32 8, %s6315_s22 }
 0x2d9   : > { %8642 = vmatprep.subr.bf16.mxu0 %v9554_v34  ;;  %8862 = vmatprep.subr.bf16.mxu1 %v9588_v41  ;;  %v4994_v52 = vmul.f32 %v9436_v26, %v10606_v49  ;;  %p6219_p4 = scmp.lt.s32.totalorder %s6218_s25, 4 }
 0x2da   : > { %7448 = vmatmul.mubr.f32.vlgmr.msra.gmra.mrb[6].mxu0 %v10019_v27 }
 0x2db   : > { %8644 = vmatpush3.bf16.msra.mxu0 %v9554_v34  ;;  %7482 = vmatprep.mubr.f32.mxu0 %v10022_v3  ;;  %v4996_v3 = vand.u32 4294901760, %v4993_v38  ;;  %v4999_v29 = vand.u32 4294901760, %v4994_v52  ;;  %s10611_s25 = smov (!%p6219_p4, %s6218_s25), 4 }
 0x2dc   : > { %8864 = vmatpush3.bf16.msra.mxu1 %v9588_v41  ;;  %8646 = vmatprep.subr.bf16.mxu0 %v9588_v41  ;;  %s6316_s16 = sshll.u32 %s10611_s25, 4 }
 0x2dd   : > { %8866 = vmatprep.subr.bf16.mxu1 %v9612_v46  ;;  %v10217_v28 = vsub.f32 %v4993_v38, %v4996_v3  ;;  %v10219_v21 = vsub.f32 %v4994_v52, %v4999_v29  ;;  %v9105_v38 = vpack.c.bf16 %v4999_v29, %v4996_v3  ;;  %v3898_v52 = vsub.f32 %v3896_v32, %v3897_v17 }
 0x2df   : > { %8648 = vmatpush3.bf16.msra.mxu0 %v9588_v41  ;;  %v5085_v31 = vand.u32 4294901760, %v10217_v28  ;;  %v5092_v9 = vand.u32 4294901760, %v10219_v21  ;;  %v3899_v33 = vand.u32 4294901760, %v3898_v52  ;;  %v9113_v29 = vpack.c.bf16 %v10219_v21, %v10217_v28 }
 0x2e0   : > { %8868 = vmatpush3.bf16.msra.mxu1 %v9612_v46  ;;  %8650 = vmatprep.subr.bf16.mxu0 %v9612_v46 }
 0x2e1   : > { %8870 = vmatprep.subr.bf16.mxu1 %v9634_v51  ;;  %v5086_v54 = vsub.f32 %v10217_v28, %v5085_v31  ;;  %v5093_v15 = vsub.f32 %v10219_v21, %v5092_v9  ;;  %v8893_v3 = vpack.c.bf16 %v3906_v50, %v3899_v33 }
 0x2e3   : > { %8652 = vmatpush3.bf16.msra.mxu0 %v9612_v46  ;;  %v5087_v26 = vand.u32 4294901760, %v5086_v54  ;;  %v5094_v49 = vand.u32 4294901760, %v5093_v15 }
 0x2e4   : > { %8872 = vmatpush3.bf16.msra.mxu1 %v9634_v51  ;;  %8654 = vmatprep.subr.bf16.mxu0 %v9634_v51 }
 0x2e5   : > { %8874 = vmatprep.subr.bf16.mxu1 %v9656_v56  ;;  %v9109_v42 = vpack.c.bf16 %v5094_v49, %v5087_v26 }
 0x2e7   : > { %8656 = vmatpush3.bf16.msra.mxu0 %v9634_v51 }
 0x2e8   : > { %8876 = vmatpush3.bf16.msra.mxu1 %v9656_v56  ;;  %8658 = vmatprep.subr.bf16.mxu0 %v9656_v56 }
 0x2e9   : > { %8878 = vmatprep.subr.bf16.mxu1 %v9668_v59 }
 0x2eb   : > { %8660 = vmatpush3.bf16.msra.mxu0 %v9656_v56 }
 0x2ec   : > { %8880 = vmatpush3.bf16.msra.mxu1 %v9668_v59  ;;  %8662 = vmatprep.subr.bf16.mxu0 %v9668_v59 }
 0x2ed   : > { %8882 = vmatprep.subr.bf16.mxu1 %v9682_v0 }
 0x2ef   : > { %8664 = vmatpush3.bf16.msra.mxu0 %v9668_v59 }
 0x2f0   : > { %8884 = vmatpush3.bf16.msra.mxu1 %v9682_v0  ;;  %8666 = vmatprep.subr.bf16.mxu0 %v9682_v0 }
 0x2f1   : > { %8886 = vmatprep.subr.bf16.mxu1 %v9694_v13 }
 0x2f3   : > { %8668 = vmatpush3.bf16.msra.mxu0 %v9682_v0 }
 0x2f4   : > { %8888 = vmatpush3.bf16.msra.mxu1 %v9694_v13  ;;  %8670 = vmatprep.subr.bf16.mxu0 %v9694_v13 }
 0x2f5   : > { %9106 = vmatprep.subr.bf16.mxu1 %v9105_v38 }
 0x2f7   : > { %7735 = vmatmul.mubr.f32.vlgmr.msra.gmra.mrb[6].mxu1 %v10009_v39  ;;  %8672 = vmatpush3.bf16.msra.mxu0 %v9694_v13  ;;  %v8897_v39 = vpack.c.bf16 %v3903_v40, %v3896_v32 }
 0x2f8   : > { %9108 = vmatpush3.bf16.msra.mxu1 %v9105_v38  ;;  %7993 = vmatprep.mubr.f32.mxu1 %v9529_v19 }
 0x2f9   : > { %8890 = vmatprep.subr.bf16.mxu0 %v8889_v53  ;;  %9110 = vmatprep.subr.bf16.mxu1 %v9109_v42 }
 0x2fa   : > { %7483 = vmatmul.mubr.f32.vlgmr.msra.gmra.mrb[6].mxu0 %v10019_v27 }
 0x2fb   : > { %7994 = vmatmul.mubr.f32.vlgmr.msra.gmra.mrb[8].mxu1 %v9531_v20  ;;  %8892 = vmatpush3.bf16.msra.mxu0 %v8889_v53 }
 0x2fc   : > { %7741 = vmatprep.mubr.f32.mxu0 %v9529_v19  ;;  %9112 = vmatpush3.bf16.msra.mxu1 %v9109_v42  ;;  %v9121_v19 = vpack.c.bf16 %v5092_v9, %v5085_v31 }
 0x2fd   : > { %8000 = vmatprep.mubr.f32.mxu1 %v9490_v4  ;;  %8894 = vmatprep.subr.bf16.mxu0 %v8893_v3 }
 0x2fe   : > { %7742 = vmatmul.mubr.f32.vlgmr.msra.gmra.mrb[8].mxu0 %v9531_v20  ;;  %9114 = vmatprep.subr.bf16.mxu1 %v9113_v29  ;;  %v8905_v20 = vpack.c.bf16 %v3904_v23, %v3897_v17 }
 0x2ff   : > { %8896 = vmatpush3.bf16.msra.mxu0 %v8893_v3  ;;  %7748 = vmatprep.mubr.f32.mxu0 %v9490_v4 }
 0x300   : > { %8898 = vmatprep.subr.bf16.mxu0 %v8897_v39 }
 0x303   : > { %8001 = vmatmul.mubr.f32.vlgmr.msra.gmra.mrb[8].mxu1 %v9492_v5 }
 0x304   : > { %9116 = vmatpush3.bf16.msra.mxu1 %v9113_v29  ;;  %8007 = vmatprep.mubr.f32.mxu1 %v9496_v6 }
 0x305   : > { %9118 = vmatprep.subr.bf16.mxu1 %v9105_v38 }
 0x306   : > { %7749 = vmatmul.mubr.f32.vlgmr.msra.gmra.mrb[8].mxu0 %v9492_v5 }
 0x307   : > { %8900 = vmatpush3.bf16.msra.mxu0 %v8897_v39  ;;  %7755 = vmatprep.mubr.f32.mxu0 %v9496_v6  ;;  %v10311_v6 = vmul.f32 %v10007_v55, %v10007_v55 }
 0x308   : > { %8902 = vmatprep.subr.bf16.mxu0 %v8889_v53 }
 0x30b   : > { %8008 = vmatmul.mubr.f32.vlgmr.msra.gmra.mrb[8].mxu1 %v9499_v7 }
 0x30c   : > { %9120 = vmatpush3.bf16.msra.mxu1 %v9105_v38  ;;  %8014 = vmatprep.mubr.f32.mxu1 %v9515_v10 }
 0x30d   : > { %9122 = vmatprep.subr.bf16.mxu1 %v9121_v19 }
 0x30e   : > { %7756 = vmatmul.mubr.f32.vlgmr.msra.gmra.mrb[8].mxu0 %v9499_v7 }
 0x30f   : > { %8904 = vmatpush3.bf16.msra.mxu0 %v8889_v53  ;;  %7762 = vmatprep.mubr.f32.mxu0 %v9515_v10 }
 0x310   : > { %8906 = vmatprep.subr.bf16.mxu0 %v8905_v20 }
 0x313   : > { %8015 = vmatmul.mubr.f32.vlgmr.msra.gmra.mrb[8].mxu1 %v9518_v11 }
 0x314   : > { %9124 = vmatpush3.bf16.msra.mxu1 %v9121_v19  ;;  %8021 = vmatprep.mubr.f32.mxu1 %v9490_v4 }
 0x315   : > { %9126 = vmatprep.subr.bf16.mxu1 %v9105_v38 }
 0x316   : > { %7763 = vmatmul.mubr.f32.vlgmr.msra.gmra.mrb[8].mxu0 %v9518_v11 }
 0x317   : > { %8908 = vmatpush3.bf16.msra.mxu0 %v8905_v20  ;;  %7769 = vmatprep.mubr.f32.mxu0 %v9490_v4 }
 0x318   : > { %8910 = vmatprep.subr.bf16.mxu0 %v8889_v53 }
 0x31b   : > { %8022 = vmatmul.mubr.f32.vlgmr.msra.gmra.mrb[8].mxu1 %v9492_v5 }
 0x31c   : > { %9128 = vmatpush3.bf16.msra.mxu1 %v9105_v38  ;;  %8028 = vmatprep.mubr.f32.mxu1 %v9490_v4 }
 0x31d   : > { %9130 = vmatprep.subr.bf16.mxu1 %v9554_v34 }
 0x31e   : > { %7770 = vmatmul.mubr.f32.vlgmr.msra.gmra.mrb[8].mxu0 %v9492_v5 }
 0x31f   : > { %8912 = vmatpush3.bf16.msra.mxu0 %v8889_v53  ;;  %7776 = vmatprep.mubr.f32.mxu0 %v9490_v4  ;;  %v10305_v4 = vmul.f32 %v10005_v43, %v10005_v43 }
 0x320   : > { %8914 = vmatprep.subr.bf16.mxu0 %v9554_v34 }
 0x323   : > { %8029 = vmatmul.mubr.f32.vlgmr.msra.gmra.mrb[8].mxu1 %v9492_v5 }
 0x324   : > { %9132 = vmatpush3.bf16.msra.mxu1 %v9554_v34 }
 0x325   : > { %9134 = vmatprep.subr.bf16.mxu1 %v9588_v41 }
 0x326   : > { %7777 = vmatmul.mubr.f32.vlgmr.msra.gmra.mrb[8].mxu0 %v9492_v5 }
 0x327   : > { %8916 = vmatpush3.bf16.msra.mxu0 %v9554_v34 }
 0x328   : > { %9136 = vmatpush3.bf16.msra.mxu1 %v9588_v41  ;;  %8918 = vmatprep.subr.bf16.mxu0 %v9588_v41 }
 0x329   : > { %9138 = vmatprep.subr.bf16.mxu1 %v9612_v46 }
 0x32b   : > { %8920 = vmatpush3.bf16.msra.mxu0 %v9588_v41 }
 0x32c   : > { %9140 = vmatpush3.bf16.msra.mxu1 %v9612_v46  ;;  %8922 = vmatprep.subr.bf16.mxu0 %v9612_v46 }
 0x32d   : > { %9142 = vmatprep.subr.bf16.mxu1 %v9634_v51 }
 0x32f   : > { %8924 = vmatpush3.bf16.msra.mxu0 %v9612_v46 }
 0x330   : > { %9144 = vmatpush3.bf16.msra.mxu1 %v9634_v51  ;;  %8926 = vmatprep.subr.bf16.mxu0 %v9634_v51 }
 0x331   : > { %9146 = vmatprep.subr.bf16.mxu1 %v9656_v56 }
 0x333   : > { %8928 = vmatpush3.bf16.msra.mxu0 %v9634_v51 }
 0x334   : > { %9148 = vmatpush3.bf16.msra.mxu1 %v9656_v56  ;;  %8930 = vmatprep.subr.bf16.mxu0 %v9656_v56 }
 0x335   : > { %9150 = vmatprep.subr.bf16.mxu1 %v9668_v59 }
 0x337   : > { %8932 = vmatpush3.bf16.msra.mxu0 %v9656_v56 }
 0x338   : > { %9152 = vmatpush3.bf16.msra.mxu1 %v9668_v59  ;;  %8934 = vmatprep.subr.bf16.mxu0 %v9668_v59 }
 0x339   : > { %9154 = vmatprep.subr.bf16.mxu1 %v9682_v0 }
 0x33b   : > { %8936 = vmatpush3.bf16.msra.mxu0 %v9668_v59 }
 0x33c   : > { %9156 = vmatpush3.bf16.msra.mxu1 %v9682_v0  ;;  %8938 = vmatprep.subr.bf16.mxu0 %v9682_v0 }
 0x33d   : > { %9158 = vmatprep.subr.bf16.mxu1 %v9694_v13 }
 0x33f   : > { %8940 = vmatpush3.bf16.msra.mxu0 %v9682_v0 }
 0x340   : > { %9160 = vmatpush3.bf16.msra.mxu1 %v9694_v13  ;;  %8942 = vmatprep.subr.bf16.mxu0 %v9694_v13 }
 0x341   : > { %9162 = vmatprep.subr.bf16.mxu1 %v9709_v25 }
 0x343   : > { %8944 = vmatpush3.bf16.msra.mxu0 %v9694_v13 }
 0x344   : > { %8946 = vmatprep.subr.bf16.mxu0 %v9709_v25 }
 0x3ca   : > { %v10307_v5 = vpop.f32.mrb[6].mxu1 }
 0x3cb   : > { %v6188_v7 = vsub.f32 %v10307_v5, %v10305_v4  ;;  %v10315_v10 = vpop.f32.mrb[7].mxu1 }
 0x3cc   : > { %v6187_v11 = vsub.f32 %v10315_v10, %v10311_v6 }
 0x3cd   : > { %v7484_v33 = vpop.f32.mrb[6].mxu0 }
 0x3ce   : > { %v10319_v50 = vmul.f32 %v7484_v33, %v7484_v33  ;;  %v10322_v27 = vmul.f32 %v10005_v43, %v7484_v33  ;;  %v2607_v42 = vpop.f32.mrb[7].mxu0 }
 0x3cf   : > { %v10324_v8 = vmul.f32 %v2607_v42, %v2607_v42  ;;  %v10327_v14 = vmul.f32 %v10007_v55, %v2607_v42 }
 0x3d0   : > { %v10331_v28 = vadd.f32 %v10319_v50, %v10305_v4  ;;  %v6221_v4 = vlaneseq }
 0x3d1   : > { %v10335_v21 = vadd.f32 %v10324_v8, %v10311_v6 }
 0x3d2   : > { %v6222_v5 = vand.u32 127, %v6221_v4 }
 0x3f6   : > { %v8030_v31 = vpop.f32.mrb[8].mxu1 }
 0x3f7   : > { %v10337_v9 = vand.u32 4294901760, %v8030_v31  ;;  %v5487_v32 = vpop.f32.mrb[9].mxu1 }
 0x3f8   : > { %v10339_v43 = vand.u32 4294901760, %v5487_v32 }
 0x3f9   : > { %v10342_v40 = vsub.f32 %v8030_v31, %v10337_v9  ;;  %v7778_v54 = vpop.f32.mrb[8].mxu0 }
 0x3fa   : > { %v10345_v55 = vsub.f32 %v5487_v32, %v10339_v43  ;;  %v10347_v15 = vand.u32 4294901760, %v7778_v54  ;;  %v4299_v17 = vpop.f32.mrb[9].mxu0 }
 0x3fb   : > { %v5590_v23 = vand.u32 4294901760, %v10342_v40  ;;  %v10350_v38 = vand.u32 4294901760, %v4299_v17 }
 0x3fc   : > { %v5580_v26 = vand.u32 4294901760, %v10345_v55  ;;  %v10354_v49 = vsub.f32 %v7778_v54, %v10347_v15 }
 0x3fd   : > { %v5591_v52 = vsub.f32 %v10342_v40, %v5590_v23  ;;  %v10360_v58 = vsub.f32 %v4299_v17, %v10350_v38 }
 0x3fe   : > { %v4402_v53 = vand.u32 4294901760, %v10354_v49  ;;  %v5581_v3 = vsub.f32 %v10345_v55, %v5580_v26 }
 0x3ff   : > { %v4392_v29 = vand.u32 4294901760, %v10360_v58  ;;  %v5592_v20 = vand.u32 4294901760, %v5591_v52 }
 0x400   : > { %v4403_v39 = vsub.f32 %v10354_v49, %v4402_v53  ;;  %v5582_v19 = vand.u32 4294901760, %v5581_v3 }
 0x401   : > { %v4393_v33 = vsub.f32 %v10360_v58, %v4392_v29 }
 0x402   : > { %8063 = vmatprep.mubr.f32.mxu1 %v5582_v19  ;;  %v4404_v31 = vand.u32 4294901760, %v4403_v39 }
 0x403   : > { %8064 = vmatmul.mubr.f32.vlgmr.msra.gmra.mrb[10].mxu1 %v5592_v20  ;;  %v4394_v42 = vand.u32 4294901760, %v4393_v33 }
 0x404   : > { %9164 = vmatpush3.bf16.msra.mxu1 %v9709_v25  ;;  %8098 = vmatprep.mubr.f32.mxu1 %v10339_v43 }
 0x405   : > { %7811 = vmatprep.mubr.f32.mxu0 %v4394_v42  ;;  %9166 = vmatprep.subr.bf16.mxu1 %v9792_v36 }
 0x406   : > { %7812 = vmatmul.mubr.f32.vlgmr.msra.gmra.mrb[10].mxu0 %v4404_v31 }
 0x407   : > { %8948 = vmatpush3.bf16.msra.mxu0 %v9709_v25  ;;  %7846 = vmatprep.mubr.f32.mxu0 %v10350_v38  ;;  %v10608_v25 = vld [vmem:[#allocation2_spill] sm:$0xff] }
 0x408   : > { %9168 = vmatpush3.bf16.msra.mxu1 %v9792_v36  ;;  %8950 = vmatprep.subr.bf16.mxu0 %v9792_v36 }
 0x409   : > { %9170 = vmatprep.subr.bf16.mxu1 %v9815_v47 }
 0x40b   : > { %8952 = vmatpush3.bf16.msra.mxu0 %v9792_v36 }
 0x40c   : > { %9172 = vmatpush3.bf16.msra.mxu1 %v9815_v47  ;;  %8954 = vmatprep.subr.bf16.mxu0 %v9815_v47 }
 0x40d   : > { %9174 = vmatprep.subr.bf16.mxu1 %v9828_v60 }
 0x40f   : > { %8956 = vmatpush3.bf16.msra.mxu0 %v9815_v47 }
 0x410   : > { %9176 = vmatpush3.bf16.msra.mxu1 %v9828_v60  ;;  %8958 = vmatprep.subr.bf16.mxu0 %v9828_v60 }
 0x411   : > { %9178 = vmatprep.subr.bf16.mxu1 %v9840_v57 }
 0x413   : > { %8960 = vmatpush3.bf16.msra.mxu0 %v9828_v60 }
 0x414   : > { %9180 = vmatpush3.bf16.msra.mxu1 %v9840_v57  ;;  %8962 = vmatprep.subr.bf16.mxu0 %v9840_v57 }
 0x415   : > { %9182 = vmatprep.subr.bf16.mxu1 %v9848_v16 }
 0x417   : > { %8964 = vmatpush3.bf16.msra.mxu0 %v9840_v57  ;;  %v6206_v57 = vadd.f32 0.0001, %v10331_v28 }
 0x418   : > { %9184 = vmatpush3.bf16.msra.mxu1 %v9848_v16  ;;  %8966 = vmatprep.subr.bf16.mxu0 %v9848_v16 }
 0x419   : > { %9186 = vmatprep.subr.bf16.mxu1 %v9716_v24 }
 0x41b   : > { %8968 = vmatpush3.bf16.msra.mxu0 %v9848_v16 }
 0x41c   : > { %9188 = vmatpush3.bf16.msra.mxu1 %v9716_v24  ;;  %8970 = vmatprep.subr.bf16.mxu0 %v9716_v24 }
 0x41d   : > { %9190 = vmatprep.subr.bf16.mxu1 %v9718_v62 }
 0x41f   : > { %8972 = vmatpush3.bf16.msra.mxu0 %v9716_v24  ;;  %v10609_v24 = vld [vmem:[#allocation3_spill] sm:$0xff] }
 0x420   : > { %9192 = vmatpush3.bf16.msra.mxu1 %v9718_v62  ;;  %8974 = vmatprep.subr.bf16.mxu0 %v9718_v62 }
 0x421   : > { %9194 = vmatprep.subr.bf16.mxu1 %v9720_v63 }
 0x423   : > { %8099 = vmatmul.mubr.f32.vlgmr.msra.gmra.mrb[10].mxu1 %v10337_v9  ;;  %8976 = vmatpush3.bf16.msra.mxu0 %v9718_v62 }
 0x424   : > { %9196 = vmatpush3.bf16.msra.mxu1 %v9720_v63  ;;  %8133 = vmatprep.mubr.f32.mxu1 %v10345_v55 }
 0x425   : > { %8978 = vmatprep.subr.bf16.mxu0 %v9720_v63  ;;  %9198 = vmatprep.subr.bf16.mxu1 %v9869_v22 }
 0x426   : > { %7847 = vmatmul.mubr.f32.vlgmr.msra.gmra.mrb[10].mxu0 %v10347_v15 }
 0x427   : > { %8980 = vmatpush3.bf16.msra.mxu0 %v9720_v63  ;;  %7881 = vmatprep.mubr.f32.mxu0 %v10360_v58 }
 0x428   : > { %9200 = vmatpush3.bf16.msra.mxu1 %v9869_v22  ;;  %8982 = vmatprep.subr.bf16.mxu0 %v9869_v22 }
 0x429   : > { %9202 = vmatprep.subr.bf16.mxu1 %v9879_v30 }
 0x42b   : > { %8984 = vmatpush3.bf16.msra.mxu0 %v9869_v22 }
 0x42c   : > { %9204 = vmatpush3.bf16.msra.mxu1 %v9879_v30  ;;  %8986 = vmatprep.subr.bf16.mxu0 %v9879_v30 }
 0x42d   : > { %9206 = vmatprep.subr.bf16.mxu1 %v9896_v12 }
 0x42f   : > { %8988 = vmatpush3.bf16.msra.mxu0 %v9879_v30  ;;  %v6205_v30 = vadd.f32 0.0001, %v10335_v21 }
 0x430   : > { %9208 = vmatpush3.bf16.msra.mxu1 %v9896_v12  ;;  %8990 = vmatprep.subr.bf16.mxu0 %v9896_v12 }
 0x431   : > { %9210 = vmatprep.subr.bf16.mxu1 %v9908_v37 }
 0x433   : > { %8992 = vmatpush3.bf16.msra.mxu0 %v9896_v12 }
 0x434   : > { %9212 = vmatpush3.bf16.msra.mxu1 %v9908_v37  ;;  %8994 = vmatprep.subr.bf16.mxu0 %v9908_v37 }
 0x435   : > { %9214 = vmatprep.subr.bf16.mxu1 %v9922_v48 }
 0x437   : > { %8996 = vmatpush3.bf16.msra.mxu0 %v9908_v37 }
 0x438   : > { %9216 = vmatpush3.bf16.msra.mxu1 %v9922_v48  ;;  %8998 = vmatprep.subr.bf16.mxu0 %v9922_v48 }
 0x439   : > { %9218 = vmatprep.subr.bf16.mxu1 %v9722_v1 }
 0x43b   : > { %9000 = vmatpush3.bf16.msra.mxu0 %v9922_v48 }
 0x43c   : > { %9220 = vmatpush3.bf16.msra.mxu1 %v9722_v1  ;;  %9002 = vmatprep.subr.bf16.mxu0 %v9722_v1 }
 0x43d   : > { %9222 = vmatprep.subr.bf16.mxu1 %v9724_v2 }
 0x43f   : > { %9004 = vmatpush3.bf16.msra.mxu0 %v9722_v1 }
 0x440   : > { %9224 = vmatpush3.bf16.msra.mxu1 %v9724_v2  ;;  %9006 = vmatprep.subr.bf16.mxu0 %v9724_v2 }
 0x441   : > { %9226 = vmatprep.subr.bf16.mxu1 %v9554_v34 }
 0x443   : > { %8134 = vmatmul.mubr.f32.vlgmr.msra.gmra.mrb[10].mxu1 %v10342_v40  ;;  %9008 = vmatpush3.bf16.msra.mxu0 %v9724_v2 }
 0x444   : > { %9228 = vmatpush3.bf16.msra.mxu1 %v9554_v34  ;;  %8168 = vmatprep.mubr.f32.mxu1 %v5580_v26 }
 0x445   : > { %9010 = vmatprep.subr.bf16.mxu0 %v9554_v34  ;;  %9230 = vmatprep.subr.bf16.mxu1 %v9588_v41 }
 0x446   : > { %7882 = vmatmul.mubr.f32.vlgmr.msra.gmra.mrb[10].mxu0 %v10354_v49 }
 0x447   : > { %9012 = vmatpush3.bf16.msra.mxu0 %v9554_v34  ;;  %7916 = vmatprep.mubr.f32.mxu0 %v4392_v29 }
 0x448   : > { %9232 = vmatpush3.bf16.msra.mxu1 %v9588_v41  ;;  %9014 = vmatprep.subr.bf16.mxu0 %v9588_v41 }
 0x449   : > { %9234 = vmatprep.subr.bf16.mxu1 %v9612_v46 }
 0x44b   : > { %9016 = vmatpush3.bf16.msra.mxu0 %v9588_v41 }
 0x44c   : > { %9236 = vmatpush3.bf16.msra.mxu1 %v9612_v46  ;;  %9018 = vmatprep.subr.bf16.mxu0 %v9612_v46 }
 0x44d   : > { %9238 = vmatprep.subr.bf16.mxu1 %v9634_v51 }
 0x44f   : > { %9020 = vmatpush3.bf16.msra.mxu0 %v9612_v46 }
 0x450   : > { %9240 = vmatpush3.bf16.msra.mxu1 %v9634_v51  ;;  %9022 = vmatprep.subr.bf16.mxu0 %v9634_v51 }
 0x451   : > { %9242 = vmatprep.subr.bf16.mxu1 %v9656_v56 }
 0x453   : > { %9024 = vmatpush3.bf16.msra.mxu0 %v9634_v51 }
 0x454   : > { %9244 = vmatpush3.bf16.msra.mxu1 %v9656_v56  ;;  %9026 = vmatprep.subr.bf16.mxu0 %v9656_v56 }
 0x455   : > { %9246 = vmatprep.subr.bf16.mxu1 %v9668_v59 }
 0x457   : > { %9028 = vmatpush3.bf16.msra.mxu0 %v9656_v56 }
 0x458   : > { %9248 = vmatpush3.bf16.msra.mxu1 %v9668_v59  ;;  %9030 = vmatprep.subr.bf16.mxu0 %v9668_v59 }
 0x459   : > { %9250 = vmatprep.subr.bf16.mxu1 %v9682_v0 }
 0x45b   : > { %9032 = vmatpush3.bf16.msra.mxu0 %v9668_v59 }
 0x45c   : > { %9252 = vmatpush3.bf16.msra.mxu1 %v9682_v0  ;;  %9034 = vmatprep.subr.bf16.mxu0 %v9682_v0 }
 0x45d   : > { %9254 = vmatprep.subr.bf16.mxu1 %v9694_v13 }
 0x45f   : > { %9036 = vmatpush3.bf16.msra.mxu0 %v9682_v0 }
 0x460   : > { %9256 = vmatpush3.bf16.msra.mxu1 %v9694_v13  ;;  %9038 = vmatprep.subr.bf16.mxu0 %v9694_v13 }
 0x461   : > { %9258 = vmatprep.subr.bf16.mxu1 %v9706_v18 }
 0x463   : > { %8169 = vmatmul.mubr.f32.vlgmr.msra.gmra.mrb[10].mxu1 %v5590_v23  ;;  %9040 = vmatpush3.bf16.msra.mxu0 %v9694_v13 }
 0x464   : > { %9260 = vmatpush3.bf16.msra.mxu1 %v9706_v18  ;;  %8203 = vmatprep.mubr.f32.mxu1 %v10339_v43 }
 0x465   : > { %9042 = vmatprep.subr.bf16.mxu0 %v9706_v18  ;;  %9262 = vmatprep.subr.bf16.mxu1 %v9784_v35 }
 0x466   : > { %7917 = vmatmul.mubr.f32.vlgmr.msra.gmra.mrb[10].mxu0 %v4402_v53 }
 0x467   : > { %9044 = vmatpush3.bf16.msra.mxu0 %v9706_v18  ;;  %7951 = vmatprep.mubr.f32.mxu0 %v10350_v38  ;;  %v10607_v18 = vld [vmem:[#allocation4_spill] sm:$0xff] }
 0x468   : > { %9264 = vmatpush3.bf16.msra.mxu1 %v9784_v35  ;;  %9046 = vmatprep.subr.bf16.mxu0 %v9784_v35 }
 0x469   : > { %9266 = vmatprep.subr.bf16.mxu1 %v9811_v44 }
 0x46b   : > { %9048 = vmatpush3.bf16.msra.mxu0 %v9784_v35 }
 0x46c   : > { %9268 = vmatpush3.bf16.msra.mxu1 %v9811_v44  ;;  %9050 = vmatprep.subr.bf16.mxu0 %v9811_v44 }
 0x46d   : > { %9270 = vmatprep.subr.bf16.mxu1 %v9817_v61 }
 0x46f   : > { %9052 = vmatpush3.bf16.msra.mxu0 %v9811_v44 }
 0x470   : > { %9272 = vmatpush3.bf16.msra.mxu1 %v9817_v61  ;;  %9054 = vmatprep.subr.bf16.mxu0 %v9817_v61 }
 0x471   : > { %9274 = vmatprep.subr.bf16.mxu1 %v9830_v45 }
 0x473   : > { %9056 = vmatpush3.bf16.msra.mxu0 %v9817_v61 }
 0x474   : > { %9276 = vmatpush3.bf16.msra.mxu1 %v9830_v45  ;;  %9058 = vmatprep.subr.bf16.mxu0 %v9830_v45 }
 0x475   : > { %9278 = vmatprep.subr.bf16.mxu1 %v10607_v18 }
 0x477   : > { %9060 = vmatpush3.bf16.msra.mxu0 %v9830_v45 }
 0x478   : > { %9280 = vmatpush3.bf16.msra.mxu1 %v10607_v18  ;;  %9062 = vmatprep.subr.bf16.mxu0 %v10607_v18 }
 0x479   : > { %9282 = vmatprep.subr.bf16.mxu1 %v10608_v25 }
 0x47b   : > { %9064 = vmatpush3.bf16.msra.mxu0 %v10607_v18 }
 0x47c   : > { %9284 = vmatpush3.bf16.msra.mxu1 %v10608_v25  ;;  %9066 = vmatprep.subr.bf16.mxu0 %v10608_v25 }
 0x47d   : > { %9286 = vmatprep.subr.bf16.mxu1 %v10609_v24 }
 0x47f   : > { %9068 = vmatpush3.bf16.msra.mxu0 %v10608_v25 }
 0x480   : > { %9288 = vmatpush3.bf16.msra.mxu1 %v10609_v24  ;;  %9070 = vmatprep.subr.bf16.mxu0 %v10609_v24 }
 0x481   : > { %9290 = vmatprep.subr.bf16.mxu1 %v9554_v34 }
 0x483   : > { %8204 = vmatmul.mubr.f32.vlgmr.msra.gmra.mrb[10].mxu1 %v10337_v9  ;;  %9072 = vmatpush3.bf16.msra.mxu0 %v10609_v24 }
 0x484   : > { %9292 = vmatpush3.bf16.msra.mxu1 %v9554_v34  ;;  %8238 = vmatprep.mubr.f32.mxu1 %v10339_v43 }
 0x485   : > { %9074 = vmatprep.subr.bf16.mxu0 %v9554_v34  ;;  %9294 = vmatprep.subr.bf16.mxu1 %v9588_v41 }
 0x486   : > { %7952 = vmatmul.mubr.f32.vlgmr.msra.gmra.mrb[10].mxu0 %v10347_v15 }
 0x487   : > { %9076 = vmatpush3.bf16.msra.mxu0 %v9554_v34  ;;  %7986 = vmatprep.mubr.f32.mxu0 %v10350_v38 }
 0x488   : > { %9296 = vmatpush3.bf16.msra.mxu1 %v9588_v41  ;;  %9078 = vmatprep.subr.bf16.mxu0 %v9588_v41 }
 0x489   : > { %9298 = vmatprep.subr.bf16.mxu1 %v9612_v46 }
 0x48b   : > { %9080 = vmatpush3.bf16.msra.mxu0 %v9588_v41  ;;  %v6194_v41 = vmul.f32 2.0, %v10322_v27 }
 0x48c   : > { %9300 = vmatpush3.bf16.msra.mxu1 %v9612_v46  ;;  %9082 = vmatprep.subr.bf16.mxu0 %v9612_v46 }
 0x48d   : > { %9302 = vmatprep.subr.bf16.mxu1 %v9634_v51 }
 0x48f   : > { %9084 = vmatpush3.bf16.msra.mxu0 %v9612_v46 }
 0x490   : > { %9304 = vmatpush3.bf16.msra.mxu1 %v9634_v51  ;;  %9086 = vmatprep.subr.bf16.mxu0 %v9634_v51 }
 0x491   : > { %9306 = vmatprep.subr.bf16.mxu1 %v9656_v56 }
 0x493   : > { %9088 = vmatpush3.bf16.msra.mxu0 %v9634_v51 }
 0x494   : > { %9308 = vmatpush3.bf16.msra.mxu1 %v9656_v56  ;;  %9090 = vmatprep.subr.bf16.mxu0 %v9656_v56 }
 0x495   : > { %9310 = vmatprep.subr.bf16.mxu1 %v9668_v59 }
 0x497   : > { %9092 = vmatpush3.bf16.msra.mxu0 %v9656_v56  ;;  %v6193_v56 = vmul.f32 2.0, %v10327_v14 }
 0x498   : > { %9312 = vmatpush3.bf16.msra.mxu1 %v9668_v59  ;;  %9094 = vmatprep.subr.bf16.mxu0 %v9668_v59 }
 0x499   : > { %9314 = vmatprep.subr.bf16.mxu1 %v9682_v0  ;;  %v6195_v44 = vadd.f32 0.0001, %v6193_v56 }
 0x49b   : > { %9096 = vmatpush3.bf16.msra.mxu0 %v9668_v59 }
 0x49c   : > { %9316 = vmatpush3.bf16.msra.mxu1 %v9682_v0  ;;  %9098 = vmatprep.subr.bf16.mxu0 %v9682_v0 }
 0x49d   : > { %9318 = vmatprep.subr.bf16.mxu1 %v9694_v13 }
 0x49f   : > { %9100 = vmatpush3.bf16.msra.mxu0 %v9682_v0 }
 0x4a0   : > { %9320 = vmatpush3.bf16.msra.mxu1 %v9694_v13  ;;  %9102 = vmatprep.subr.bf16.mxu0 %v9694_v13 }
 0x4a3   : > { %8239 = vmatmul.mubr.f32.vlgmr.msra.gmra.mrb[10].mxu1 %v10337_v9  ;;  %9104 = vmatpush3.bf16.msra.mxu0 %v9694_v13  ;;  %v6196_v13 = vadd.f32 0.0001, %v6194_v41 }
 0x4a6   : > { %7987 = vmatmul.mubr.f32.vlgmr.msra.gmra.mrb[10].mxu0 %v10347_v15 }
 0x576   : > { %v8240_v34 = vpop.f32.mrb[10].mxu1 }
 0x577   : > { %v6192_v46 = vsub.f32 %v8240_v34, %v10322_v27  ;;  %v6171_v51 = vpop.f32.mrb[11].mxu1 }
 0x578   : > { %v6191_v59 = vsub.f32 %v6171_v51, %v10327_v14 }
 0x579   : > { %v6198_v0 = vmul.f32 2.0, %v6192_v46  ;;  %v7988_v62 = vpop.f32.mrb[10].mxu0 }
 0x57a   : > { %v6197_v63 = vmul.f32 2.0, %v6191_v59  ;;  %v6190_v1 = vsub.f32 %v7988_v62, %v10319_v50  ;;  %v4983_v2 = vpop.f32.mrb[11].mxu0 }
 0x57b   : > { %v6200_v35 = vadd.f32 0.0009, %v6198_v0  ;;  %v6189_v36 = vsub.f32 %v4983_v2, %v10324_v8 }
 0x57c   : > { %v6199_v47 = vadd.f32 0.0009, %v6197_v63  ;;  %v6208_v61 = vadd.f32 %v6190_v1, %v6188_v7  ;;  %v6224_v7 = vstv %s6316_s16 }
 0x57d   : > { %v6202_v60 = vmul.f32 %v6200_v35, %v6196_v13  ;;  %v6207_v45 = vadd.f32 %v6189_v36, %v6187_v11  ;;  %vm6225_vm1 = vcmp.lt.s32.totalorder %v6222_v5, %v6224_v7 }
 0x57e   : > { %v6201_v16 = vmul.f32 %v6199_v47, %v6195_v44  ;;  %v6210_v22 = vadd.f32 0.0009, %v6208_v61 }
 0x57f   : > { %v6209_v12 = vadd.f32 0.0009, %v6207_v45 }
 0x580   : > { %v6212_v37 = vmul.f32 %v6210_v22, %v6206_v57 }
 0x581   : > { %v6211_v48 = vmul.f32 %v6209_v12, %v6205_v30 }
 0x582   : > { %9431 = vrcp.f32 %v6212_v37 }
 0x583   : > { %9433 = vrcp.f32 %v6211_v48 }
 0x58c   : > { %v9432_v50 = vpop.eup %9431 }
 0x58d   : > { %v9434_v6 = vpop.eup %9433  ;;  %v6216_v10 = vmul.f32 %v9432_v50, %v6202_v60 }
 0x58e   : > { %v6214_v11 = vmul.f32 %v9434_v6, %v6201_v16 }
 0x58f   : > { %v6227_v27 = vsel %vm6225_vm1, %v6216_v10, 0.0 }
 0x590   : > { %v6226_v8 = vsel %vm6225_vm1, %v6214_v11, 0.0 }
 0x591   : > { %v6228_v14 = vadd.f32 %v6227_v27, %v6226_v8 }
 0x593   : > { %6229 = vadd.xlane.f32.xlu0 %v6228_v14 }
 0x620   : > { %v6230_v28 = vpop.xlane.xlu0 %6229 }
 0x621   : > { %v6231_v21 = vrot.slane %v6230_v28, 4 }
 0x623   : > { %v6232_v9 = vadd.f32 %v6231_v21, %v6230_v28 }
 0x625   : > { %v6233_v32 = vrot.slane %v6232_v9, 2 }
 0x627   : > { %v6234_v43 = vadd.f32 %v6233_v32, %v6232_v9 }
 0x629   : > { %v6235_v40 = vrot.slane %v6234_v43, 1 }
 0x62b   : > { %v6236_v54 = vadd.f32 %v6235_v40, %v6234_v43 }
 0x62d   : > { %9421 = vpush %v6236_v54 }
 0x65e   : > { %s9422_s20 = spop %9421 }
 0x65f   : > { %v6238_v55 = vstv %s9422_s20 }
 0x660   : > { %6239 = vst [vmem:[%s215_s19] sm:$0xff] %v6238_v55 }
 0x661 PF: > { %s14_s15 = sadd.s32 1, %s9443_s15  }
 0x662   : > { %p11_p5 = scmp.ge.s32.totalorder %s14_s15, 4  }
 0x664   :  { %13 = sbr.rel (!%p11_p5) target bundleno = 1 (0x1), region = 69 }

</bundles_post_ra>
